<compile_context>
chip_gen: v7x
topology: tpu7x:2x2x1
jax: 0.10.0
libtpu: 0.0.40
codegen_flags: <defaults>
</compile_context>

<pallas_src>
import math
from functools import partial

import jax
import jax.numpy as jnp
from jax.experimental import pallas as pl
from jax.experimental.pallas import tpu as pltpu

# ------------------------- configuration (small demo sizes) ------------------
D_MODEL = 32
D_FF = 64
N_HEADS = 4
D_K = D_MODEL // N_HEADS
KSIZE = 7                     # cov_kernel_size (odd)
FFN_SCALE = 0.5
LN_EPS = 1e-5
BN_EPS = 1e-5
NEG_INF = -1e9
# matmul operand dtype (accumulation is always f32 via preferred_element_type).
# Set to jnp.float32 for exact f32 parity with the PyTorch reference.
MM_DTYPE = jnp.bfloat16

# "Natural" parameter layout (PyTorch-like, linear weights pre-transposed to (in, out)).
PARAM_SPECS = [
    ("macaron_norm_gamma", (1, D_MODEL)), ("macaron_norm_beta", (1, D_MODEL)),
    ("pre_ffn1_w", (D_MODEL, 2 * D_FF)),  ("pre_ffn1_b", (1, 2 * D_FF)),
    ("pre_ffn2_w", (D_FF, D_MODEL)),      ("pre_ffn2_b", (1, D_MODEL)),
    ("mha_norm_gamma", (1, D_MODEL)),     ("mha_norm_beta", (1, D_MODEL)),
    ("qkv_w", (D_MODEL, 3 * D_MODEL)),    ("qkv_b", (1, 3 * D_MODEL)),
    ("pos_w", (D_MODEL, D_MODEL)),        # pos projection has no bias
    ("pos_bias_u", (N_HEADS, D_K)),       ("pos_bias_v", (N_HEADS, D_K)),
    ("attn_out_w", (D_MODEL, D_MODEL)),   ("attn_out_b", (1, D_MODEL)),
    ("conv_norm_gamma", (1, D_MODEL)),    ("conv_norm_beta", (1, D_MODEL)),
    ("pw1_w", (D_MODEL, 2 * D_MODEL)),    ("pw1_b", (1, 2 * D_MODEL)),
    ("dw_w", (KSIZE, D_MODEL)),           ("dw_b", (1, D_MODEL)),
    ("bn_gamma", (1, D_MODEL)),           ("bn_beta", (1, D_MODEL)),
    ("bn_mean", (1, D_MODEL)),            ("bn_var", (1, D_MODEL)),
    ("pw2_w", (D_MODEL, D_MODEL)),        ("pw2_b", (1, D_MODEL)),
    ("post_norm_gamma", (1, D_MODEL)),    ("post_norm_beta", (1, D_MODEL)),
    ("final_norm_gamma", (1, D_MODEL)),   ("final_norm_beta", (1, D_MODEL)),
]

# ------------------------ packed parameter tables -----------------------------
# f32 "vector" table: every (1, N) parameter is one row (width padded to VEC_COLS).
VEC_SPECS = [
    ("macaron_norm_gamma", D_MODEL), ("macaron_norm_beta", D_MODEL),
    ("pre_ffn1_b_v", D_FF), ("pre_ffn1_b_g", D_FF),
    ("pre_ffn2_b", D_MODEL),
    ("mha_norm_gamma", D_MODEL), ("mha_norm_beta", D_MODEL),
    ("q_b", D_MODEL), ("k_b", D_MODEL), ("v_b", D_MODEL),
    ("attn_out_b", D_MODEL),
    ("conv_norm_gamma", D_MODEL), ("conv_norm_beta", D_MODEL),
    ("pw1_b_v", D_MODEL), ("pw1_b_g", D_MODEL),
    ("dw_b", D_MODEL),
    ("bn_gamma", D_MODEL), ("bn_beta", D_MODEL), ("bn_mean", D_MODEL), ("bn_var", D_MODEL),
    ("pw2_b", D_MODEL),
    ("post_norm_gamma", D_MODEL), ("post_norm_beta", D_MODEL),
    ("final_norm_gamma", D_MODEL), ("final_norm_beta", D_MODEL),
] + [(f"dw_w_{k}", D_MODEL) for k in range(KSIZE)]
VEC_ROW = {name: i for i, (name, _) in enumerate(VEC_SPECS)}
VEC_W = {name: w for name, w in VEC_SPECS}
VEC_ROWS = len(VEC_SPECS)
VEC_COLS = max(w for _, w in VEC_SPECS)

# bf16 weight table: matmul weights stacked as row blocks (16-row aligned).
WT_SPECS = [
    ("pre_ffn1_w_v", D_MODEL, D_FF), ("pre_ffn1_w_g", D_MODEL, D_FF),
    ("pre_ffn2_w",   D_FF,    D_MODEL),
    ("q_w", D_MODEL, D_MODEL), ("k_w", D_MODEL, D_MODEL), ("v_w", D_MODEL, D_MODEL),
    ("attn_out_w", D_MODEL, D_MODEL),
    ("pw1_w_v", D_MODEL, D_MODEL), ("pw1_w_g", D_MODEL, D_MODEL),
    ("pw2_w", D_MODEL, D_MODEL),
]


def _build_wt_layout():
    layout, off = {}, 0
    for name, r, c in WT_SPECS:
        layout[name] = (off, r, c)
        off += ((r + 15) // 16) * 16
    return layout, off


WT_LAYOUT, WT_ROWS = _build_wt_layout()
WT_COLS = max(c for _, _, c in WT_SPECS)


def pack_params(params):
    """Split fused / GLU weights and pack everything into two tables."""
    D, F = D_MODEL, D_FF
    s = dict(params)
    # F.glu(x): value = first half, gate = second half.
    s["pre_ffn1_w_v"] = params["pre_ffn1_w"][:, :F]
    s["pre_ffn1_w_g"] = params["pre_ffn1_w"][:, F:]
    s["pre_ffn1_b_v"] = params["pre_ffn1_b"][:, :F]
    s["pre_ffn1_b_g"] = params["pre_ffn1_b"][:, F:]
    s["q_w"], s["k_w"], s["v_w"] = (params["qkv_w"][:, :D],
                                    params["qkv_w"][:, D:2 * D],
                                    params["qkv_w"][:, 2 * D:])
    s["q_b"], s["k_b"], s["v_b"] = (params["qkv_b"][:, :D],
                                    params["qkv_b"][:, D:2 * D],
                                    params["qkv_b"][:, 2 * D:])
    s["pw1_w_v"] = params["pw1_w"][:, :D]
    s["pw1_w_g"] = params["pw1_w"][:, D:]
    s["pw1_b_v"] = params["pw1_b"][:, :D]
    s["pw1_b_g"] = params["pw1_b"][:, D:]
    for k in range(KSIZE):
        s[f"dw_w_{k}"] = params["dw_w"][k:k + 1, :]

    vtab = jnp.zeros((VEC_ROWS, VEC_COLS), jnp.float32)
    for name, w in VEC_SPECS:
        vtab = vtab.at[VEC_ROW[name], :w].set(s[name].reshape(w).astype(jnp.float32))

    wtab = jnp.zeros((WT_ROWS, WT_COLS), MM_DTYPE)
    for name, r, c in WT_SPECS:
        off, _, _ = WT_LAYOUT[name]
        wtab = wtab.at[off:off + r, :c].set(s[name].astype(MM_DTYPE))
    return vtab, wtab


# --------------------------------- the kernel ---------------------------------
def conformer_block_kernel(block_b, seq_len, with_attw,
                           x_ref, mask_ref, pp_ref, uv_ref, vtab_ref, wtab_ref,
                           *out_refs):
    if with_attw:
        y_ref, attw_ref, dwbuf_ref = out_refs
    else:
        (y_ref, dwbuf_ref), attw_ref = out_refs, None

    Bb, T = block_b, seq_len
    D, H, dk = D_MODEL, N_HEADS, D_K
    R, G = Bb * T, Bb * H

    def vp(name):                                   # (1, width) f32 row from the vec table
        r = VEC_ROW[name]
        return vtab_ref[r:r + 1, 0:VEC_W[name]]

    def wp(name):                                   # (rows, cols) bf16 weight from the table
        off, rows, cols = WT_LAYOUT[name]
        return wtab_ref[off:off + rows, 0:cols]

    def mm(a, w):                                   # bf16 operands, f32 accumulation
        return jnp.dot(a.astype(MM_DTYPE), w, preferred_element_type=jnp.float32)

    def layer_norm(t, gname, bname):
        mu = jnp.mean(t, axis=-1, keepdims=True)
        var = jnp.mean(jnp.square(t - mu), axis=-1, keepdims=True)
        return (t - mu) * jax.lax.rsqrt(var + LN_EPS) * vp(gname) + vp(bname)

    x = x_ref[...].reshape(R, D)                    # fold (Bb, T) into rows

    # ---- 1. macaron feed-forward: x + 0.5 * FFN(LN(x)) (GLU) ----
    h = layer_norm(x, "macaron_norm_gamma", "macaron_norm_beta")
    ff = (mm(h, wp("pre_ffn1_w_v")) + vp("pre_ffn1_b_v")) * \
        jax.nn.sigmoid(mm(h, wp("pre_ffn1_w_g")) + vp("pre_ffn1_b_g"))
    ff = mm(ff, wp("pre_ffn2_w")) + vp("pre_ffn2_b")
    x = x + FFN_SCALE * ff

    # ---- 2. relative-positional multi-head self-attention (all heads batched) ----
    h = layer_norm(x, "mha_norm_gamma", "mha_norm_beta")
    q = mm(h, wp("q_w")) + vp("q_b")
    k = mm(h, wp("k_w")) + vp("k_b")
    v = mm(h, wp("v_w")) + vp("v_b")

    def split_heads(t):                             # (R, D) -> (G, T, dk)
        t3 = t.reshape(Bb, T, D)
        return jnp.stack([t3[:, :, i * dk:(i + 1) * dk] for i in range(H)],
                         axis=1).reshape(G, T, dk)

    q_g, k_g, v_g = split_heads(q), split_heads(k), split_heads(v)
    u_bias = uv_ref[0]                              # (G, 1, dk)
    v_bias = uv_ref[1]

    # content term: one batched matmul over all (batch, head) pairs.
    ac = jnp.einsum("gik,gjk->gij",
                    (q_g + u_bias).astype(MM_DTYPE), k_g.astype(MM_DTYPE),
                    preferred_element_type=jnp.float32)          # (G, T, T)

    # positional term: pproj rows were pre-gathered per (head, query, key) in the wrapper
    # (Transformer-XL relative shift), so no in-kernel slice/concat/reshape is needed.
    qv = q_g + v_bias                                            # (G, T, dk) f32
    bd = jnp.zeros((G, T, T), jnp.float32)
    for kk in range(dk):                                         # dk-tap multiply-accumulate
        bd = bd + qv[:, :, kk:kk + 1] * pp_ref[kk]               # (G,T,1) * (G,T,T)

    scores = (ac + bd) * (1.0 / math.sqrt(dk))
    # key-padding mask (hoisted, applied once for all heads).
    # NOTE: a fully-masked key row degenerates to a uniform distribution (same as reference).
    scores = jnp.where(mask_ref[...] > 0.0, scores, NEG_INF)
    scores = scores - jnp.max(scores, axis=-1, keepdims=True)
    e = jnp.exp(scores)
    w = e * pl.reciprocal(jnp.sum(e, axis=-1, keepdims=True), approx=True)
    if attw_ref is not None:
        attw_ref[...] = w                                        # single full-block store

    ctx = jnp.einsum("gij,gjk->gik", w.astype(MM_DTYPE), v_g.astype(MM_DTYPE),
                     preferred_element_type=jnp.float32)         # (G, T, dk)
    ctx = ctx.reshape(Bb, H, T, dk)
    ctx = jnp.concatenate([ctx[:, i] for i in range(H)], axis=-1).reshape(R, D)
    x = x + mm(ctx, wp("attn_out_w")) + vp("attn_out_b")

    # ---- 3. Conformer convolution module ----
    # (the reference ConformerConvolutionModule ignores `mask`; likewise here)
    h = layer_norm(x, "conv_norm_gamma", "conv_norm_beta")
    h = (mm(h, wp("pw1_w_v")) + vp("pw1_b_v")) * \
        jax.nn.sigmoid(mm(h, wp("pw1_w_g")) + vp("pw1_b_g"))     # (R, D) GLU over channels
    pad = (KSIZE - 1) // 2
    # depthwise conv along time: h stays resident in a zero-padded VMEM scratch; the K taps
    # are static sublane-offset loads (per-sequence zero padding => no cross-batch leakage).
    dwbuf_ref[...] = jnp.zeros((Bb, T + KSIZE - 1, D), jnp.float32)
    dwbuf_ref[:, pad:pad + T, :] = h.reshape(Bb, T, D)
    acc = jnp.zeros((Bb, T, D), jnp.float32)
    for kk in range(KSIZE):
        acc = acc + dwbuf_ref[:, kk:kk + T, :] * vp(f"dw_w_{kk}")
    dwc = acc.reshape(R, D) + vp("dw_b")
    # BatchNorm1d (inference / running statistics), then Swish, then pointwise conv 2
    dwc = (dwc - vp("bn_mean")) * jax.lax.rsqrt(vp("bn_var") + BN_EPS) * vp("bn_gamma") \
        + vp("bn_beta")
    dwc = dwc * jax.nn.sigmoid(dwc)
    x = x + mm(dwc, wp("pw2_w")) + vp("pw2_b")

    # ---- 4. post_ffn_norm then final_norm (exactly as reference forward()) ----
    x = layer_norm(x, "post_norm_gamma", "post_norm_beta")
    x = layer_norm(x, "final_norm_gamma", "final_norm_beta")
    y_ref[...] = x.reshape(Bb, T, D)


# --------------------------------- wrapper ------------------------------------
def conformer_block(x, mask, pos, params, *, block_b=None, return_attn_weights=True):
    B, T, D = x.shape
    assert D == D_MODEL
    H, dk = N_HEADS, D_K
    if block_b is None:
        # batch rows per step (amortize per-step overhead) while keeping >=2 grid steps
        # so both v7x TensorCores get work; cap rows per block to stay VMEM-friendly.
        block_b = max(1, min(B // 2, max(1, 1024 // T)))
    while B % block_b:
        block_b -= 1
    grid_b = B // block_b
    G, R = block_b * H, block_b * T

    vtab, wtab = pack_params(params)

    # ---- batch-invariant precompute, kept OUT of the kernel ----
    pproj = jnp.dot(pos[0], params["pos_w"])                         # (2T-1, D)
    pproj_h = pproj.reshape(2 * T - 1, H, dk).transpose(1, 0, 2)     # (H, 2T-1, dk)
    rel = (T - 1) - jnp.arange(T)[:, None] + jnp.arange(T)[None, :]  # rel-shift gather indices
    pp = pproj_h[:, rel, :]                                          # (H, T, T, dk)
    pp = jnp.transpose(pp, (3, 0, 1, 2))                             # (dk, H, T, T)
    pp_g = jnp.tile(pp, (1, block_b, 1, 1)).astype(jnp.float32)      # (dk, G, T, T)

    u_g = jnp.tile(params["pos_bias_u"], (block_b, 1))[:, None, :]   # (G, 1, dk)
    v_g = jnp.tile(params["pos_bias_v"], (block_b, 1))[:, None, :]
    uv_g = jnp.stack([u_g, v_g], axis=0).astype(jnp.float32)         # (2, G, 1, dk)

    mask_g = jnp.repeat(mask.astype(jnp.float32), H, axis=0)         # (B*H, 1, T)

    kernel = partial(conformer_block_kernel, block_b, T, return_attn_weights)

    in_specs = [
        pl.BlockSpec((block_b, T, D), lambda b: (b, 0, 0)),          # x
        pl.BlockSpec((G, 1, T), lambda b: (b, 0, 0)),                # per-(batch,head) mask
        pl.BlockSpec((dk, G, T, T), lambda b: (0, 0, 0, 0)),         # shifted pos projection
        pl.BlockSpec((2, G, 1, dk), lambda b: (0, 0, 0, 0)),         # pos_bias_u / pos_bias_v
        pl.BlockSpec(vtab.shape, lambda b: (0, 0)),                  # packed f32 vectors
        pl.BlockSpec(wtab.shape, lambda b: (0, 0)),                  # packed bf16 weights
    ]
    y_shape = jax.ShapeDtypeStruct((B, T, D), jnp.float32)
    y_spec = pl.BlockSpec((block_b, T, D), lambda b: (b, 0, 0))
    if return_attn_weights:
        out_shape = (y_shape, jax.ShapeDtypeStruct((B * H, T, T), jnp.float32))
        out_specs = (y_spec, pl.BlockSpec((G, T, T), lambda b: (b, 0, 0)))
    else:
        out_shape, out_specs = y_shape, y_spec

    outs = pl.pallas_call(
        kernel,
        grid=(grid_b,),
        in_specs=in_specs,
        out_specs=out_specs,
        out_shape=out_shape,
        scratch_shapes=[pltpu.VMEM((block_b, T + KSIZE - 1, D), jnp.float32)],
        compiler_params=pltpu.CompilerParams(dimension_semantics=("parallel",)),
    )(x, mask_g, pp_g, uv_g, vtab, wtab)

    if return_attn_weights:
        y, attw = outs
        return y, attw.reshape(B, H, T, T)
    return outs, None


# ---------------------------- pure-JAX reference --------------------------------
def conformer_block_reference(x, mask, pos, params):
    """f32 reference mirroring the PyTorch module's forward()."""
    D, H, dk, F = D_MODEL, N_HEADS, D_K, D_FF
    B, T, _ = x.shape

    def ln(t, g, b):
        mu = jnp.mean(t, axis=-1, keepdims=True)
        var = jnp.mean(jnp.square(t - mu), axis=-1, keepdims=True)
        return (t - mu) * jax.lax.rsqrt(var + LN_EPS) * g + b

    # macaron FFN
    h = ln(x, params["macaron_norm_gamma"], params["macaron_norm_beta"])
    h1 = h @ params["pre_ffn1_w"] + params["pre_ffn1_b"]
    h1 = h1[..., :F] * jax.nn.sigmoid(h1[..., F:])
    x = x + FFN_SCALE * (h1 @ params["pre_ffn2_w"] + params["pre_ffn2_b"])

    # rel-pos MHA
    h = ln(x, params["mha_norm_gamma"], params["mha_norm_beta"])
    qkv = h @ params["qkv_w"] + params["qkv_b"]
    q, k, v = qkv[..., :D], qkv[..., D:2 * D], qkv[..., 2 * D:]

    def heads(t):
        return t.reshape(B, T, H, dk).transpose(0, 2, 1, 3)

    qh, kh, vh = heads(q), heads(k), heads(v)
    pproj = (pos[0] @ params["pos_w"]).reshape(2 * T - 1, H, dk).transpose(1, 0, 2)
    ac = jnp.einsum("bhik,bhjk->bhij", qh + params["pos_bias_u"][None, :, None, :], kh)
    bd_raw = jnp.einsum("bhik,hpk->bhip", qh + params["pos_bias_v"][None, :, None, :], pproj)
    rel = (T - 1) - jnp.arange(T)[:, None] + jnp.arange(T)[None, :]
    rel = jnp.broadcast_to(rel[None, None], (B, H, T, T))
    bd = jnp.take_along_axis(bd_raw, rel, axis=-1)
    scores = (ac + bd) / math.sqrt(dk)
    scores = jnp.where(mask[:, None, :, :] > 0, scores, NEG_INF)
    w = jax.nn.softmax(scores, axis=-1)
    ctx = jnp.einsum("bhij,bhjk->bhik", w, vh).transpose(0, 2, 1, 3).reshape(B, T, D)
    x = x + ctx @ params["attn_out_w"] + params["attn_out_b"]

    # conv module
    h = ln(x, params["conv_norm_gamma"], params["conv_norm_beta"])
    h1 = h @ params["pw1_w"] + params["pw1_b"]
    h1 = h1[..., :D] * jax.nn.sigmoid(h1[..., D:])
    pad = (KSIZE - 1) // 2
    hp = jnp.pad(h1, ((0, 0), (pad, pad), (0, 0)))
    dw = sum(hp[:, kk:kk + T, :] * params["dw_w"][kk] for kk in range(KSIZE)) + params["dw_b"]
    dw = (dw - params["bn_mean"]) * jax.lax.rsqrt(params["bn_var"] + BN_EPS) * \
        params["bn_gamma"] + params["bn_beta"]
    dw = dw * jax.nn.sigmoid(dw)
    x = x + dw @ params["pw2_w"] + params["pw2_b"]

    x = ln(x, params["post_norm_gamma"], params["post_norm_beta"])
    x = ln(x, params["final_norm_gamma"], params["final_norm_beta"])
    return x, w


# ------------------------------ parameter init ---------------------------------
def init_params(key):
    params = {}
    keys = jax.random.split(key, len(PARAM_SPECS))
    for (name, shape), k in zip(PARAM_SPECS, keys):
        if name.endswith("_gamma") or name == "bn_var":
            arr = jnp.ones(shape, jnp.float32)
        elif name.endswith("_beta") or name == "bn_mean":
            arr = jnp.zeros(shape, jnp.float32)
        elif name.endswith("_b"):
            arr = 0.02 * jax.random.normal(k, shape, jnp.float32)
        else:
            arr = 0.1 * jax.random.normal(k, shape, jnp.float32)
        params[name] = arr
    return params


def rel_positional_encoding(seq_len, d_model):
    # positions T-1 ... -(T-1)  ->  index 0 corresponds to relative distance T-1
    positions = jnp.arange(seq_len - 1, -seq_len, -1, dtype=jnp.float32)
    inv = jnp.exp(jnp.arange(0, d_model, 2, dtype=jnp.float32)
                  * (-math.log(10000.0) / d_model))
    ang = positions[:, None] * inv[None, :]
    pe = jnp.zeros((2 * seq_len - 1, d_model), jnp.float32)
    pe = pe.at[:, 0::2].set(jnp.sin(ang))
    pe = pe.at[:, 1::2].set(jnp.cos(ang))
    return pe[None]                                        # (1, 2T-1, d_model)


# ----------------------------------- main ---------------------------------------
if __name__ == "__main__":
    B, T = 2, 8
    key = jax.random.PRNGKey(0)
    kx, kp = jax.random.split(key)

    x = jax.random.normal(kx, (B, T, D_MODEL), jnp.float32)
    mask = jnp.ones((B, 1, T), jnp.float32)
    mask = mask.at[1, 0, 6:].set(0.0)        # second sequence has 2 padded frames
    pos = rel_positional_encoding(T, D_MODEL)
    params = init_params(kp)

    y, attw = conformer_block(x, mask, pos, params)
    jax.block_until_ready((y, attw))

    assert y.shape == (B, T, D_MODEL)
    assert attw.shape == (B, N_HEADS, T, T)
    assert bool(jnp.all(jnp.isfinite(y)))
    assert bool(jnp.all(jnp.isfinite(attw)))

    # correctness guard against an f32 pure-JAX reference (loose tolerance: the kernel uses
    # bf16 matmul operands and an approximate softmax reciprocal).
    y_expected, w_expected = conformer_block_reference(x, mask, pos, params)
    assert float(jnp.max(jnp.abs(y - y_expected))) < 1.5e-1
    assert float(jnp.max(jnp.abs(attw - w_expected))) < 5e-2

    print("KERNEL_OK")
</pallas_src>

<mosaic_0001>
module attributes {stable_mosaic.version = 11 : i64} {
  func.func @conformer_block_kernel(%arg0: i32, %arg1: memref<1x8x32xf32, #tpu.memory_space<vmem>>, %arg2: memref<4x1x8xf32, #tpu.memory_space<vmem>>, %arg3: memref<8x4x8x8xf32, #tpu.memory_space<vmem>>, %arg4: memref<2x4x1x8xf32, #tpu.memory_space<vmem>>, %arg5: memref<32x64xf32, #tpu.memory_space<vmem>>, %arg6: memref<352x64xbf16, #tpu.memory_space<vmem>>, %arg7: memref<1x8x32xf32, #tpu.memory_space<vmem>>, %arg8: memref<4x8x8xf32, #tpu.memory_space<vmem>>, %arg9: memref<1x14x32xf32, #tpu.memory_space<vmem>>) attributes {dimension_semantics = [#tpu.dimension_semantics<parallel>], iteration_bounds = array<i64: 2>, scalar_prefetch = 0 : i64, scratch_operands = 1 : i64, tpu.core_type = #tpu.core_type<tc>, window_params = [{transform_indices = @transform_0, window_bounds = array<i64: 1, 8, 32>}, {transform_indices = @transform_1, window_bounds = array<i64: 4, 1, 8>}, {pipeline_mode = #tpu.pipeline_mode<synchronous>, transform_indices = @transform_2, window_bounds = array<i64: 8, 4, 8, 8>}, {pipeline_mode = #tpu.pipeline_mode<synchronous>, transform_indices = @transform_3, window_bounds = array<i64: 2, 4, 1, 8>}, {pipeline_mode = #tpu.pipeline_mode<synchronous>, transform_indices = @transform_4, window_bounds = array<i64: 32, 64>}, {pipeline_mode = #tpu.pipeline_mode<synchronous>, transform_indices = @transform_5, window_bounds = array<i64: 352, 64>}, {transform_indices = @transform_6, window_bounds = array<i64: 1, 8, 32>}, {transform_indices = @transform_7, window_bounds = array<i64: 4, 8, 8>}]} {
    %c0 = arith.constant 0 : index
    %c0_0 = arith.constant 0 : index
    %c0_1 = arith.constant 0 : index
    %0 = vector.load %arg1[%c0, %c0_0, %c0_1] : memref<1x8x32xf32, #tpu.memory_space<vmem>>, vector<1x8x32xf32>
    %1 = vector.shape_cast %0 : vector<1x8x32xf32> to vector<8x32xf32>
    %cst = arith.constant dense<0.000000e+00> : vector<8xf32>
    %2 = vector.multi_reduction <add>, %1, %cst [1] : vector<8x32xf32> to vector<8xf32>
    %3 = vector.shape_cast %2 : vector<8xf32> to vector<8x1xf32>
    %cst_2 = arith.constant 3.200000e+01 : f32
    %4 = vector.broadcast %cst_2 : f32 to vector<8x1xf32>
    %5 = arith.divf %3, %4 : vector<8x1xf32>
    %6 = vector.broadcast %5 : vector<8x1xf32> to vector<8x32xf32>
    %7 = arith.subf %1, %6 : vector<8x32xf32>
    %8 = arith.mulf %7, %7 : vector<8x32xf32>
    %cst_3 = arith.constant dense<0.000000e+00> : vector<8xf32>
    %9 = vector.multi_reduction <add>, %8, %cst_3 [1] : vector<8x32xf32> to vector<8xf32>
    %10 = vector.shape_cast %9 : vector<8xf32> to vector<8x1xf32>
    %cst_4 = arith.constant 3.200000e+01 : f32
    %11 = vector.broadcast %cst_4 : f32 to vector<8x1xf32>
    %12 = arith.divf %10, %11 : vector<8x1xf32>
    %13 = vector.broadcast %5 : vector<8x1xf32> to vector<8x32xf32>
    %14 = arith.subf %1, %13 : vector<8x32xf32>
    %cst_5 = arith.constant 9.99999974E-6 : f32
    %15 = vector.broadcast %cst_5 : f32 to vector<8x1xf32>
    %16 = arith.addf %12, %15 : vector<8x1xf32>
    %17 = math.rsqrt %16 : vector<8x1xf32>
    %18 = vector.broadcast %17 : vector<8x1xf32> to vector<8x32xf32>
    %19 = arith.mulf %14, %18 : vector<8x32xf32>
    %c0_6 = arith.constant 0 : index
    %c0_7 = arith.constant 0 : index
    %20 = vector.load %arg5[%c0_6, %c0_7] : memref<32x64xf32, #tpu.memory_space<vmem>>, vector<1x32xf32>
    %21 = vector.broadcast %20 : vector<1x32xf32> to vector<8x32xf32>
    %22 = arith.mulf %19, %21 : vector<8x32xf32>
    %c1 = arith.constant 1 : index
    %c0_8 = arith.constant 0 : index
    %23 = vector.load %arg5[%c1, %c0_8] : memref<32x64xf32, #tpu.memory_space<vmem>>, vector<1x32xf32>
    %24 = vector.broadcast %23 : vector<1x32xf32> to vector<8x32xf32>
    %25 = arith.addf %22, %24 : vector<8x32xf32>
    %c0_9 = arith.constant 0 : index
    %c0_10 = arith.constant 0 : index
    %26 = vector.load %arg6[%c0_9, %c0_10] : memref<352x64xbf16, #tpu.memory_space<vmem>>, vector<32x64xbf16>
    %27 = arith.truncf %25 : vector<8x32xf32> to vector<8x32xbf16>
    %cst_11 = arith.constant dense<0.000000e+00> : vector<8x64xf32>
    %28 = tpu.matmul %27, %26, %cst_11 {dimension_numbers = #tpu.dot_dimension_numbers<[1], [0], [0], [1], [0, 0, 1, 1], [], []>} : vector<8x32xbf16>, vector<32x64xbf16>, vector<8x64xf32> -> vector<8x64xf32>
    %c2 = arith.constant 2 : index
    %c0_12 = arith.constant 0 : index
    %29 = vector.load %arg5[%c2, %c0_12] : memref<32x64xf32, #tpu.memory_space<vmem>>, vector<1x64xf32>
    %30 = vector.broadcast %29 : vector<1x64xf32> to vector<8x64xf32>
    %31 = arith.addf %28, %30 : vector<8x64xf32>
    %c32 = arith.constant 32 : index
    %c0_13 = arith.constant 0 : index
    %32 = vector.load %arg6[%c32, %c0_13] : memref<352x64xbf16, #tpu.memory_space<vmem>>, vector<32x64xbf16>
    %33 = arith.truncf %25 : vector<8x32xf32> to vector<8x32xbf16>
    %cst_14 = arith.constant dense<0.000000e+00> : vector<8x64xf32>
    %34 = tpu.matmul %33, %32, %cst_14 {dimension_numbers = #tpu.dot_dimension_numbers<[1], [0], [0], [1], [0, 0, 1, 1], [], []>} : vector<8x32xbf16>, vector<32x64xbf16>, vector<8x64xf32> -> vector<8x64xf32>
    %c3 = arith.constant 3 : index
    %c0_15 = arith.constant 0 : index
    %35 = vector.load %arg5[%c3, %c0_15] : memref<32x64xf32, #tpu.memory_space<vmem>>, vector<1x64xf32>
    %36 = vector.broadcast %35 : vector<1x64xf32> to vector<8x64xf32>
    %37 = arith.addf %34, %36 : vector<8x64xf32>
    %38 = arith.negf %37 : vector<8x64xf32>
    %39 = math.exp %38 : vector<8x64xf32>
    %cst_16 = arith.constant 1.000000e+00 : f32
    %40 = vector.broadcast %cst_16 : f32 to vector<8x64xf32>
    %41 = arith.addf %40, %39 : vector<8x64xf32>
    %42 = arith.divf %40, %41 : vector<8x64xf32>
    %43 = arith.mulf %31, %42 : vector<8x64xf32>
    %c64 = arith.constant 64 : index
    %c0_17 = arith.constant 0 : index
    %44 = vector.load %arg6[%c64, %c0_17] : memref<352x64xbf16, #tpu.memory_space<vmem>>, vector<64x32xbf16>
    %45 = arith.truncf %43 : vector<8x64xf32> to vector<8x64xbf16>
    %cst_18 = arith.constant dense<0.000000e+00> : vector<8x32xf32>
    %46 = tpu.matmul %45, %44, %cst_18 {dimension_numbers = #tpu.dot_dimension_numbers<[1], [0], [0], [1], [0, 0, 1, 1], [], []>} : vector<8x64xbf16>, vector<64x32xbf16>, vector<8x32xf32> -> vector<8x32xf32>
    %c4 = arith.constant 4 : index
    %c0_19 = arith.constant 0 : index
    %47 = vector.load %arg5[%c4, %c0_19] : memref<32x64xf32, #tpu.memory_space<vmem>>, vector<1x32xf32>
    %48 = vector.broadcast %47 : vector<1x32xf32> to vector<8x32xf32>
    %49 = arith.addf %46, %48 : vector<8x32xf32>
    %cst_20 = arith.constant 5.000000e-01 : f32
    %50 = vector.broadcast %cst_20 : f32 to vector<8x32xf32>
    %51 = arith.mulf %50, %49 : vector<8x32xf32>
    %52 = arith.addf %1, %51 : vector<8x32xf32>
    %cst_21 = arith.constant dense<0.000000e+00> : vector<8xf32>
    %53 = vector.multi_reduction <add>, %52, %cst_21 [1] : vector<8x32xf32> to vector<8xf32>
    %54 = vector.shape_cast %53 : vector<8xf32> to vector<8x1xf32>
    %cst_22 = arith.constant 3.200000e+01 : f32
    %55 = vector.broadcast %cst_22 : f32 to vector<8x1xf32>
    %56 = arith.divf %54, %55 : vector<8x1xf32>
    %57 = vector.broadcast %56 : vector<8x1xf32> to vector<8x32xf32>
    %58 = arith.subf %52, %57 : vector<8x32xf32>
    %59 = arith.mulf %58, %58 : vector<8x32xf32>
    %cst_23 = arith.constant dense<0.000000e+00> : vector<8xf32>
    %60 = vector.multi_reduction <add>, %59, %cst_23 [1] : vector<8x32xf32> to vector<8xf32>
    %61 = vector.shape_cast %60 : vector<8xf32> to vector<8x1xf32>
    %cst_24 = arith.constant 3.200000e+01 : f32
    %62 = vector.broadcast %cst_24 : f32 to vector<8x1xf32>
    %63 = arith.divf %61, %62 : vector<8x1xf32>
    %64 = vector.broadcast %56 : vector<8x1xf32> to vector<8x32xf32>
    %65 = arith.subf %52, %64 : vector<8x32xf32>
    %cst_25 = arith.constant 9.99999974E-6 : f32
    %66 = vector.broadcast %cst_25 : f32 to vector<8x1xf32>
    %67 = arith.addf %63, %66 : vector<8x1xf32>
    %68 = math.rsqrt %67 : vector<8x1xf32>
    %69 = vector.broadcast %68 : vector<8x1xf32> to vector<8x32xf32>
    %70 = arith.mulf %65, %69 : vector<8x32xf32>
    %c5 = arith.constant 5 : index
    %c0_26 = arith.constant 0 : index
    %71 = vector.load %arg5[%c5, %c0_26] : memref<32x64xf32, #tpu.memory_space<vmem>>, vector<1x32xf32>
    %72 = vector.broadcast %71 : vector<1x32xf32> to vector<8x32xf32>
    %73 = arith.mulf %70, %72 : vector<8x32xf32>
    %c6 = arith.constant 6 : index
    %c0_27 = arith.constant 0 : index
    %74 = vector.load %arg5[%c6, %c0_27] : memref<32x64xf32, #tpu.memory_space<vmem>>, vector<1x32xf32>
    %75 = vector.broadcast %74 : vector<1x32xf32> to vector<8x32xf32>
    %76 = arith.addf %73, %75 : vector<8x32xf32>
    %c128 = arith.constant 128 : index
    %c0_28 = arith.constant 0 : index
    %77 = vector.load %arg6[%c128, %c0_28] : memref<352x64xbf16, #tpu.memory_space<vmem>>, vector<32x32xbf16>
    %78 = arith.truncf %76 : vector<8x32xf32> to vector<8x32xbf16>
    %cst_29 = arith.constant dense<0.000000e+00> : vector<8x32xf32>
    %79 = tpu.matmul %78, %77, %cst_29 {dimension_numbers = #tpu.dot_dimension_numbers<[1], [0], [0], [1], [0, 0, 1, 1], [], []>} : vector<8x32xbf16>, vector<32x32xbf16>, vector<8x32xf32> -> vector<8x32xf32>
    %c7 = arith.constant 7 : index
    %c0_30 = arith.constant 0 : index
    %80 = vector.load %arg5[%c7, %c0_30] : memref<32x64xf32, #tpu.memory_space<vmem>>, vector<1x32xf32>
    %81 = vector.broadcast %80 : vector<1x32xf32> to vector<8x32xf32>
    %82 = arith.addf %79, %81 : vector<8x32xf32>
    %c160 = arith.constant 160 : index
    %c0_31 = arith.constant 0 : index
    %83 = vector.load %arg6[%c160, %c0_31] : memref<352x64xbf16, #tpu.memory_space<vmem>>, vector<32x32xbf16>
    %84 = arith.truncf %76 : vector<8x32xf32> to vector<8x32xbf16>
    %cst_32 = arith.constant dense<0.000000e+00> : vector<8x32xf32>
    %85 = tpu.matmul %84, %83, %cst_32 {dimension_numbers = #tpu.dot_dimension_numbers<[1], [0], [0], [1], [0, 0, 1, 1], [], []>} : vector<8x32xbf16>, vector<32x32xbf16>, vector<8x32xf32> -> vector<8x32xf32>
    %c8 = arith.constant 8 : index
    %c0_33 = arith.constant 0 : index
    %86 = vector.load %arg5[%c8, %c0_33] : memref<32x64xf32, #tpu.memory_space<vmem>>, vector<1x32xf32>
    %87 = vector.broadcast %86 : vector<1x32xf32> to vector<8x32xf32>
    %88 = arith.addf %85, %87 : vector<8x32xf32>
    %c192 = arith.constant 192 : index
    %c0_34 = arith.constant 0 : index
    %89 = vector.load %arg6[%c192, %c0_34] : memref<352x64xbf16, #tpu.memory_space<vmem>>, vector<32x32xbf16>
    %90 = arith.truncf %76 : vector<8x32xf32> to vector<8x32xbf16>
    %cst_35 = arith.constant dense<0.000000e+00> : vector<8x32xf32>
    %91 = tpu.matmul %90, %89, %cst_35 {dimension_numbers = #tpu.dot_dimension_numbers<[1], [0], [0], [1], [0, 0, 1, 1], [], []>} : vector<8x32xbf16>, vector<32x32xbf16>, vector<8x32xf32> -> vector<8x32xf32>
    %c9 = arith.constant 9 : index
    %c0_36 = arith.constant 0 : index
    %92 = vector.load %arg5[%c9, %c0_36] : memref<32x64xf32, #tpu.memory_space<vmem>>, vector<1x32xf32>
    %93 = vector.broadcast %92 : vector<1x32xf32> to vector<8x32xf32>
    %94 = arith.addf %91, %93 : vector<8x32xf32>
    %95 = vector.shape_cast %82 : vector<8x32xf32> to vector<1x8x32xf32>
    %96 = vector.extract_strided_slice %95 {offsets = [0, 0, 0], sizes = [1, 8, 8], strides = [1, 1, 1]} : vector<1x8x32xf32> to vector<1x8x8xf32>
    %97 = vector.extract_strided_slice %95 {offsets = [0, 0, 8], sizes = [1, 8, 8], strides = [1, 1, 1]} : vector<1x8x32xf32> to vector<1x8x8xf32>
    %98 = vector.extract_strided_slice %95 {offsets = [0, 0, 16], sizes = [1, 8, 8], strides = [1, 1, 1]} : vector<1x8x32xf32> to vector<1x8x8xf32>
    %99 = vector.extract_strided_slice %95 {offsets = [0, 0, 24], sizes = [1, 8, 8], strides = [1, 1, 1]} : vector<1x8x32xf32> to vector<1x8x8xf32>
    %100 = vector.shape_cast %96 : vector<1x8x8xf32> to vector<1x1x8x8xf32>
    %101 = vector.shape_cast %97 : vector<1x8x8xf32> to vector<1x1x8x8xf32>
    %102 = vector.shape_cast %98 : vector<1x8x8xf32> to vector<1x1x8x8xf32>
    %103 = vector.shape_cast %99 : vector<1x8x8xf32> to vector<1x1x8x8xf32>
    %104 = tpu.concatenate %100, %101, %102, %103 in 1 : vector<1x1x8x8xf32>, vector<1x1x8x8xf32>, vector<1x1x8x8xf32>, vector<1x1x8x8xf32> -> vector<1x4x8x8xf32>
    %105 = vector.shape_cast %104 : vector<1x4x8x8xf32> to vector<4x8x8xf32>
    %106 = vector.shape_cast %88 : vector<8x32xf32> to vector<1x8x32xf32>
    %107 = vector.extract_strided_slice %106 {offsets = [0, 0, 0], sizes = [1, 8, 8], strides = [1, 1, 1]} : vector<1x8x32xf32> to vector<1x8x8xf32>
    %108 = vector.extract_strided_slice %106 {offsets = [0, 0, 8], sizes = [1, 8, 8], strides = [1, 1, 1]} : vector<1x8x32xf32> to vector<1x8x8xf32>
    %109 = vector.extract_strided_slice %106 {offsets = [0, 0, 16], sizes = [1, 8, 8], strides = [1, 1, 1]} : vector<1x8x32xf32> to vector<1x8x8xf32>
    %110 = vector.extract_strided_slice %106 {offsets = [0, 0, 24], sizes = [1, 8, 8], strides = [1, 1, 1]} : vector<1x8x32xf32> to vector<1x8x8xf32>
    %111 = vector.shape_cast %107 : vector<1x8x8xf32> to vector<1x1x8x8xf32>
    %112 = vector.shape_cast %108 : vector<1x8x8xf32> to vector<1x1x8x8xf32>
    %113 = vector.shape_cast %109 : vector<1x8x8xf32> to vector<1x1x8x8xf32>
    %114 = vector.shape_cast %110 : vector<1x8x8xf32> to vector<1x1x8x8xf32>
    %115 = tpu.concatenate %111, %112, %113, %114 in 1 : vector<1x1x8x8xf32>, vector<1x1x8x8xf32>, vector<1x1x8x8xf32>, vector<1x1x8x8xf32> -> vector<1x4x8x8xf32>
    %116 = vector.shape_cast %115 : vector<1x4x8x8xf32> to vector<4x8x8xf32>
    %117 = vector.shape_cast %94 : vector<8x32xf32> to vector<1x8x32xf32>
    %118 = vector.extract_strided_slice %117 {offsets = [0, 0, 0], sizes = [1, 8, 8], strides = [1, 1, 1]} : vector<1x8x32xf32> to vector<1x8x8xf32>
    %119 = vector.extract_strided_slice %117 {offsets = [0, 0, 8], sizes = [1, 8, 8], strides = [1, 1, 1]} : vector<1x8x32xf32> to vector<1x8x8xf32>
    %120 = vector.extract_strided_slice %117 {offsets = [0, 0, 16], sizes = [1, 8, 8], strides = [1, 1, 1]} : vector<1x8x32xf32> to vector<1x8x8xf32>
    %121 = vector.extract_strided_slice %117 {offsets = [0, 0, 24], sizes = [1, 8, 8], strides = [1, 1, 1]} : vector<1x8x32xf32> to vector<1x8x8xf32>
    %122 = vector.shape_cast %118 : vector<1x8x8xf32> to vector<1x1x8x8xf32>
    %123 = vector.shape_cast %119 : vector<1x8x8xf32> to vector<1x1x8x8xf32>
    %124 = vector.shape_cast %120 : vector<1x8x8xf32> to vector<1x1x8x8xf32>
    %125 = vector.shape_cast %121 : vector<1x8x8xf32> to vector<1x1x8x8xf32>
    %126 = tpu.concatenate %122, %123, %124, %125 in 1 : vector<1x1x8x8xf32>, vector<1x1x8x8xf32>, vector<1x1x8x8xf32>, vector<1x1x8x8xf32> -> vector<1x4x8x8xf32>
    %127 = vector.shape_cast %126 : vector<1x4x8x8xf32> to vector<4x8x8xf32>
    %c0_37 = arith.constant 0 : index
    %c0_38 = arith.constant 0 : index
    %c0_39 = arith.constant 0 : index
    %c0_40 = arith.constant 0 : index
    %128 = vector.load %arg4[%c0_37, %c0_38, %c0_39, %c0_40] : memref<2x4x1x8xf32, #tpu.memory_space<vmem>>, vector<1x4x1x8xf32>
    %129 = vector.shape_cast %128 : vector<1x4x1x8xf32> to vector<4x1x8xf32>
    %c1_41 = arith.constant 1 : index
    %c0_42 = arith.constant 0 : index
    %c0_43 = arith.constant 0 : index
    %c0_44 = arith.constant 0 : index
    %130 = vector.load %arg4[%c1_41, %c0_42, %c0_43, %c0_44] : memref<2x4x1x8xf32, #tpu.memory_space<vmem>>, vector<1x4x1x8xf32>
    %131 = vector.shape_cast %130 : vector<1x4x1x8xf32> to vector<4x1x8xf32>
    %132 = vector.broadcast %129 : vector<4x1x8xf32> to vector<4x8x8xf32>
    %133 = arith.addf %105, %132 : vector<4x8x8xf32>
    %134 = arith.truncf %133 : vector<4x8x8xf32> to vector<4x8x8xbf16>
    %135 = arith.truncf %116 : vector<4x8x8xf32> to vector<4x8x8xbf16>
    "tpu.trace_start"() <{level = 10 : i32, message = "gik,gjk->gij"}> : () -> ()
    %cst_45 = arith.constant dense<0.000000e+00> : vector<4x8x8xf32>
    %136 = tpu.matmul %134, %135, %cst_45 {dimension_numbers = #tpu.dot_dimension_numbers<[2], [2], [1], [1], [0, 0, 0, 1, 1, 1], [0], [0]>} : vector<4x8x8xbf16>, vector<4x8x8xbf16>, vector<4x8x8xf32> -> vector<4x8x8xf32>
    "tpu.trace_stop"() : () -> ()
    %137 = vector.broadcast %131 : vector<4x1x8xf32> to vector<4x8x8xf32>
    %138 = arith.addf %105, %137 : vector<4x8x8xf32>
    %cst_46 = arith.constant 0.000000e+00 : f32
    %139 = vector.broadcast %cst_46 : f32 to vector<4x8x8xf32>
    %140 = vector.extract_strided_slice %138 {offsets = [0, 0, 0], sizes = [4, 8, 1], strides = [1, 1, 1]} : vector<4x8x8xf32> to vector<4x8x1xf32>
    %c0_47 = arith.constant 0 : index
    %c0_48 = arith.constant 0 : index
    %c0_49 = arith.constant 0 : index
    %c0_50 = arith.constant 0 : index
    %141 = vector.load %arg3[%c0_47, %c0_48, %c0_49, %c0_50] : memref<8x4x8x8xf32, #tpu.memory_space<vmem>>, vector<1x4x8x8xf32>
    %142 = vector.shape_cast %141 : vector<1x4x8x8xf32> to vector<4x8x8xf32>
    %143 = vector.broadcast %140 : vector<4x8x1xf32> to vector<4x8x8xf32>
    %144 = arith.mulf %143, %142 : vector<4x8x8xf32>
    %145 = arith.addf %139, %144 : vector<4x8x8xf32>
    %146 = vector.extract_strided_slice %138 {offsets = [0, 0, 1], sizes = [4, 8, 1], strides = [1, 1, 1]} : vector<4x8x8xf32> to vector<4x8x1xf32>
    %c1_51 = arith.constant 1 : index
    %c0_52 = arith.constant 0 : index
    %c0_53 = arith.constant 0 : index
    %c0_54 = arith.constant 0 : index
    %147 = vector.load %arg3[%c1_51, %c0_52, %c0_53, %c0_54] : memref<8x4x8x8xf32, #tpu.memory_space<vmem>>, vector<1x4x8x8xf32>
    %148 = vector.shape_cast %147 : vector<1x4x8x8xf32> to vector<4x8x8xf32>
    %149 = vector.broadcast %146 : vector<4x8x1xf32> to vector<4x8x8xf32>
    %150 = arith.mulf %149, %148 : vector<4x8x8xf32>
    %151 = arith.addf %145, %150 : vector<4x8x8xf32>
    %152 = vector.extract_strided_slice %138 {offsets = [0, 0, 2], sizes = [4, 8, 1], strides = [1, 1, 1]} : vector<4x8x8xf32> to vector<4x8x1xf32>
    %c2_55 = arith.constant 2 : index
    %c0_56 = arith.constant 0 : index
    %c0_57 = arith.constant 0 : index
    %c0_58 = arith.constant 0 : index
    %153 = vector.load %arg3[%c2_55, %c0_56, %c0_57, %c0_58] : memref<8x4x8x8xf32, #tpu.memory_space<vmem>>, vector<1x4x8x8xf32>
    %154 = vector.shape_cast %153 : vector<1x4x8x8xf32> to vector<4x8x8xf32>
    %155 = vector.broadcast %152 : vector<4x8x1xf32> to vector<4x8x8xf32>
    %156 = arith.mulf %155, %154 : vector<4x8x8xf32>
    %157 = arith.addf %151, %156 : vector<4x8x8xf32>
    %158 = vector.extract_strided_slice %138 {offsets = [0, 0, 3], sizes = [4, 8, 1], strides = [1, 1, 1]} : vector<4x8x8xf32> to vector<4x8x1xf32>
    %c3_59 = arith.constant 3 : index
    %c0_60 = arith.constant 0 : index
    %c0_61 = arith.constant 0 : index
    %c0_62 = arith.constant 0 : index
    %159 = vector.load %arg3[%c3_59, %c0_60, %c0_61, %c0_62] : memref<8x4x8x8xf32, #tpu.memory_space<vmem>>, vector<1x4x8x8xf32>
    %160 = vector.shape_cast %159 : vector<1x4x8x8xf32> to vector<4x8x8xf32>
    %161 = vector.broadcast %158 : vector<4x8x1xf32> to vector<4x8x8xf32>
    %162 = arith.mulf %161, %160 : vector<4x8x8xf32>
    %163 = arith.addf %157, %162 : vector<4x8x8xf32>
    %164 = vector.extract_strided_slice %138 {offsets = [0, 0, 4], sizes = [4, 8, 1], strides = [1, 1, 1]} : vector<4x8x8xf32> to vector<4x8x1xf32>
    %c4_63 = arith.constant 4 : index
    %c0_64 = arith.constant 0 : index
    %c0_65 = arith.constant 0 : index
    %c0_66 = arith.constant 0 : index
    %165 = vector.load %arg3[%c4_63, %c0_64, %c0_65, %c0_66] : memref<8x4x8x8xf32, #tpu.memory_space<vmem>>, vector<1x4x8x8xf32>
    %166 = vector.shape_cast %165 : vector<1x4x8x8xf32> to vector<4x8x8xf32>
    %167 = vector.broadcast %164 : vector<4x8x1xf32> to vector<4x8x8xf32>
    %168 = arith.mulf %167, %166 : vector<4x8x8xf32>
    %169 = arith.addf %163, %168 : vector<4x8x8xf32>
    %170 = vector.extract_strided_slice %138 {offsets = [0, 0, 5], sizes = [4, 8, 1], strides = [1, 1, 1]} : vector<4x8x8xf32> to vector<4x8x1xf32>
    %c5_67 = arith.constant 5 : index
    %c0_68 = arith.constant 0 : index
    %c0_69 = arith.constant 0 : index
    %c0_70 = arith.constant 0 : index
    %171 = vector.load %arg3[%c5_67, %c0_68, %c0_69, %c0_70] : memref<8x4x8x8xf32, #tpu.memory_space<vmem>>, vector<1x4x8x8xf32>
    %172 = vector.shape_cast %171 : vector<1x4x8x8xf32> to vector<4x8x8xf32>
    %173 = vector.broadcast %170 : vector<4x8x1xf32> to vector<4x8x8xf32>
    %174 = arith.mulf %173, %172 : vector<4x8x8xf32>
    %175 = arith.addf %169, %174 : vector<4x8x8xf32>
    %176 = vector.extract_strided_slice %138 {offsets = [0, 0, 6], sizes = [4, 8, 1], strides = [1, 1, 1]} : vector<4x8x8xf32> to vector<4x8x1xf32>
    %c6_71 = arith.constant 6 : index
    %c0_72 = arith.constant 0 : index
    %c0_73 = arith.constant 0 : index
    %c0_74 = arith.constant 0 : index
    %177 = vector.load %arg3[%c6_71, %c0_72, %c0_73, %c0_74] : memref<8x4x8x8xf32, #tpu.memory_space<vmem>>, vector<1x4x8x8xf32>
    %178 = vector.shape_cast %177 : vector<1x4x8x8xf32> to vector<4x8x8xf32>
    %179 = vector.broadcast %176 : vector<4x8x1xf32> to vector<4x8x8xf32>
    %180 = arith.mulf %179, %178 : vector<4x8x8xf32>
    %181 = arith.addf %175, %180 : vector<4x8x8xf32>
    %182 = vector.extract_strided_slice %138 {offsets = [0, 0, 7], sizes = [4, 8, 1], strides = [1, 1, 1]} : vector<4x8x8xf32> to vector<4x8x1xf32>
    %c7_75 = arith.constant 7 : index
    %c0_76 = arith.constant 0 : index
    %c0_77 = arith.constant 0 : index
    %c0_78 = arith.constant 0 : index
    %183 = vector.load %arg3[%c7_75, %c0_76, %c0_77, %c0_78] : memref<8x4x8x8xf32, #tpu.memory_space<vmem>>, vector<1x4x8x8xf32>
    %184 = vector.shape_cast %183 : vector<1x4x8x8xf32> to vector<4x8x8xf32>
    %185 = vector.broadcast %182 : vector<4x8x1xf32> to vector<4x8x8xf32>
    %186 = arith.mulf %185, %184 : vector<4x8x8xf32>
    %187 = arith.addf %181, %186 : vector<4x8x8xf32>
    %188 = arith.addf %136, %187 : vector<4x8x8xf32>
    %cst_79 = arith.constant 0.353553385 : f32
    %189 = vector.broadcast %cst_79 : f32 to vector<4x8x8xf32>
    %190 = arith.mulf %188, %189 : vector<4x8x8xf32>
    %c0_80 = arith.constant 0 : index
    %c0_81 = arith.constant 0 : index
    %c0_82 = arith.constant 0 : index
    %191 = vector.load %arg2[%c0_80, %c0_81, %c0_82] : memref<4x1x8xf32, #tpu.memory_space<vmem>>, vector<4x1x8xf32>
    %cst_83 = arith.constant 0.000000e+00 : f32
    %192 = vector.broadcast %cst_83 : f32 to vector<4x1x8xf32>
    %193 = arith.cmpf ogt, %191, %192 : vector<4x1x8xf32>
    %cst_84 = arith.constant -1.000000e+09 : f32
    %194 = vector.shape_cast %193 : vector<4x1x8xi1> to vector<4x1x8xi1>
    %195 = vector.broadcast %194 : vector<4x1x8xi1> to vector<4x8x8xi1>
    %196 = vector.broadcast %cst_84 : f32 to vector<4x8x8xf32>
    %197 = arith.select %195, %190, %196 : vector<4x8x8xi1>, vector<4x8x8xf32>
    %cst_85 = arith.constant dense<0xFF800000> : vector<4x8xf32>
    %198 = vector.multi_reduction <maximumf>, %197, %cst_85 [2] : vector<4x8x8xf32> to vector<4x8xf32>
    %199 = vector.shape_cast %198 : vector<4x8xf32> to vector<4x8x1xf32>
    %200 = vector.broadcast %199 : vector<4x8x1xf32> to vector<4x8x8xf32>
    %201 = arith.subf %197, %200 : vector<4x8x8xf32>
    %202 = math.exp %201 : vector<4x8x8xf32>
    %cst_86 = arith.constant dense<0.000000e+00> : vector<4x8xf32>
    %203 = vector.multi_reduction <add>, %202, %cst_86 [2] : vector<4x8x8xf32> to vector<4x8xf32>
    %204 = vector.shape_cast %203 : vector<4x8xf32> to vector<4x8x1xf32>
    %205 = tpu.reciprocal %204 {approx = true} : vector<4x8x1xf32> -> vector<4x8x1xf32>
    %206 = vector.broadcast %205 : vector<4x8x1xf32> to vector<4x8x8xf32>
    %207 = arith.mulf %202, %206 : vector<4x8x8xf32>
    %c0_87 = arith.constant 0 : index
    %c0_88 = arith.constant 0 : index
    %c0_89 = arith.constant 0 : index
    %208 = vector.load %arg8[%c0_87, %c0_88, %c0_89] : memref<4x8x8xf32, #tpu.memory_space<vmem>>, vector<4x8x8xf32>
    tpu.vector_store %arg8[%c0_87, %c0_88, %c0_89], %207 {strides = array<i32>} : memref<4x8x8xf32, #tpu.memory_space<vmem>>, vector<4x8x8xf32>,
    %209 = arith.truncf %207 : vector<4x8x8xf32> to vector<4x8x8xbf16>
    %210 = arith.truncf %127 : vector<4x8x8xf32> to vector<4x8x8xbf16>
    "tpu.trace_start"() <{level = 10 : i32, message = "gij,gjk->gik"}> : () -> ()
    %cst_90 = arith.constant dense<0.000000e+00> : vector<4x8x8xf32>
    %211 = tpu.matmul %209, %210, %cst_90 {dimension_numbers = #tpu.dot_dimension_numbers<[2], [1], [1], [2], [0, 0, 0, 1, 1, 2], [0], [0]>} : vector<4x8x8xbf16>, vector<4x8x8xbf16>, vector<4x8x8xf32> -> vector<4x8x8xf32>
    "tpu.trace_stop"() : () -> ()
    %212 = vector.shape_cast %211 : vector<4x8x8xf32> to vector<1x4x8x8xf32>
    %213 = vector.extract_strided_slice %212 {offsets = [0, 0, 0, 0], sizes = [1, 1, 8, 8], strides = [1, 1, 1, 1]} : vector<1x4x8x8xf32> to vector<1x1x8x8xf32>
    %214 = vector.shape_cast %213 : vector<1x1x8x8xf32> to vector<1x8x8xf32>
    %215 = vector.extract_strided_slice %212 {offsets = [0, 1, 0, 0], sizes = [1, 1, 8, 8], strides = [1, 1, 1, 1]} : vector<1x4x8x8xf32> to vector<1x1x8x8xf32>
    %216 = vector.shape_cast %215 : vector<1x1x8x8xf32> to vector<1x8x8xf32>
    %217 = vector.extract_strided_slice %212 {offsets = [0, 2, 0, 0], sizes = [1, 1, 8, 8], strides = [1, 1, 1, 1]} : vector<1x4x8x8xf32> to vector<1x1x8x8xf32>
    %218 = vector.shape_cast %217 : vector<1x1x8x8xf32> to vector<1x8x8xf32>
    %219 = vector.extract_strided_slice %212 {offsets = [0, 3, 0, 0], sizes = [1, 1, 8, 8], strides = [1, 1, 1, 1]} : vector<1x4x8x8xf32> to vector<1x1x8x8xf32>
    %220 = vector.shape_cast %219 : vector<1x1x8x8xf32> to vector<1x8x8xf32>
    %221 = tpu.concatenate %214, %216, %218, %220 in 2 : vector<1x8x8xf32>, vector<1x8x8xf32>, vector<1x8x8xf32>, vector<1x8x8xf32> -> vector<1x8x32xf32>
    %222 = vector.shape_cast %221 : vector<1x8x32xf32> to vector<8x32xf32>
    %c224 = arith.constant 224 : index
    %c0_91 = arith.constant 0 : index
    %223 = vector.load %arg6[%c224, %c0_91] : memref<352x64xbf16, #tpu.memory_space<vmem>>, vector<32x32xbf16>
    %224 = arith.truncf %222 : vector<8x32xf32> to vector<8x32xbf16>
    %cst_92 = arith.constant dense<0.000000e+00> : vector<8x32xf32>
    %225 = tpu.matmul %224, %223, %cst_92 {dimension_numbers = #tpu.dot_dimension_numbers<[1], [0], [0], [1], [0, 0, 1, 1], [], []>} : vector<8x32xbf16>, vector<32x32xbf16>, vector<8x32xf32> -> vector<8x32xf32>
    %226 = arith.addf %52, %225 : vector<8x32xf32>
    %c10 = arith.constant 10 : index
    %c0_93 = arith.constant 0 : index
    %227 = vector.load %arg5[%c10, %c0_93] : memref<32x64xf32, #tpu.memory_space<vmem>>, vector<1x32xf32>
    %228 = vector.broadcast %227 : vector<1x32xf32> to vector<8x32xf32>
    %229 = arith.addf %226, %228 : vector<8x32xf32>
    %cst_94 = arith.constant dense<0.000000e+00> : vector<8xf32>
    %230 = vector.multi_reduction <add>, %229, %cst_94 [1] : vector<8x32xf32> to vector<8xf32>
    %231 = vector.shape_cast %230 : vector<8xf32> to vector<8x1xf32>
    %cst_95 = arith.constant 3.200000e+01 : f32
    %232 = vector.broadcast %cst_95 : f32 to vector<8x1xf32>
    %233 = arith.divf %231, %232 : vector<8x1xf32>
    %234 = vector.broadcast %233 : vector<8x1xf32> to vector<8x32xf32>
    %235 = arith.subf %229, %234 : vector<8x32xf32>
    %236 = arith.mulf %235, %235 : vector<8x32xf32>
    %cst_96 = arith.constant dense<0.000000e+00> : vector<8xf32>
    %237 = vector.multi_reduction <add>, %236, %cst_96 [1] : vector<8x32xf32> to vector<8xf32>
    %238 = vector.shape_cast %237 : vector<8xf32> to vector<8x1xf32>
    %cst_97 = arith.constant 3.200000e+01 : f32
    %239 = vector.broadcast %cst_97 : f32 to vector<8x1xf32>
    %240 = arith.divf %238, %239 : vector<8x1xf32>
    %241 = vector.broadcast %233 : vector<8x1xf32> to vector<8x32xf32>
    %242 = arith.subf %229, %241 : vector<8x32xf32>
    %cst_98 = arith.constant 9.99999974E-6 : f32
    %243 = vector.broadcast %cst_98 : f32 to vector<8x1xf32>
    %244 = arith.addf %240, %243 : vector<8x1xf32>
    %245 = math.rsqrt %244 : vector<8x1xf32>
    %246 = vector.broadcast %245 : vector<8x1xf32> to vector<8x32xf32>
    %247 = arith.mulf %242, %246 : vector<8x32xf32>
    %c11 = arith.constant 11 : index
    %c0_99 = arith.constant 0 : index
    %248 = vector.load %arg5[%c11, %c0_99] : memref<32x64xf32, #tpu.memory_space<vmem>>, vector<1x32xf32>
    %249 = vector.broadcast %248 : vector<1x32xf32> to vector<8x32xf32>
    %250 = arith.mulf %247, %249 : vector<8x32xf32>
    %c12 = arith.constant 12 : index
    %c0_100 = arith.constant 0 : index
    %251 = vector.load %arg5[%c12, %c0_100] : memref<32x64xf32, #tpu.memory_space<vmem>>, vector<1x32xf32>
    %252 = vector.broadcast %251 : vector<1x32xf32> to vector<8x32xf32>
    %253 = arith.addf %250, %252 : vector<8x32xf32>
    %c256 = arith.constant 256 : index
    %c0_101 = arith.constant 0 : index
    %254 = vector.load %arg6[%c256, %c0_101] : memref<352x64xbf16, #tpu.memory_space<vmem>>, vector<32x32xbf16>
    %255 = arith.truncf %253 : vector<8x32xf32> to vector<8x32xbf16>
    %cst_102 = arith.constant dense<0.000000e+00> : vector<8x32xf32>
    %256 = tpu.matmul %255, %254, %cst_102 {dimension_numbers = #tpu.dot_dimension_numbers<[1], [0], [0], [1], [0, 0, 1, 1], [], []>} : vector<8x32xbf16>, vector<32x32xbf16>, vector<8x32xf32> -> vector<8x32xf32>
    %c13 = arith.constant 13 : index
    %c0_103 = arith.constant 0 : index
    %257 = vector.load %arg5[%c13, %c0_103] : memref<32x64xf32, #tpu.memory_space<vmem>>, vector<1x32xf32>
    %258 = vector.broadcast %257 : vector<1x32xf32> to vector<8x32xf32>
    %259 = arith.addf %256, %258 : vector<8x32xf32>
    %c288 = arith.constant 288 : index
    %c0_104 = arith.constant 0 : index
    %260 = vector.load %arg6[%c288, %c0_104] : memref<352x64xbf16, #tpu.memory_space<vmem>>, vector<32x32xbf16>
    %261 = arith.truncf %253 : vector<8x32xf32> to vector<8x32xbf16>
    %cst_105 = arith.constant dense<0.000000e+00> : vector<8x32xf32>
    %262 = tpu.matmul %261, %260, %cst_105 {dimension_numbers = #tpu.dot_dimension_numbers<[1], [0], [0], [1], [0, 0, 1, 1], [], []>} : vector<8x32xbf16>, vector<32x32xbf16>, vector<8x32xf32> -> vector<8x32xf32>
    %c14 = arith.constant 14 : index
    %c0_106 = arith.constant 0 : index
    %263 = vector.load %arg5[%c14, %c0_106] : memref<32x64xf32, #tpu.memory_space<vmem>>, vector<1x32xf32>
    %264 = vector.broadcast %263 : vector<1x32xf32> to vector<8x32xf32>
    %265 = arith.addf %262, %264 : vector<8x32xf32>
    %266 = arith.negf %265 : vector<8x32xf32>
    %267 = math.exp %266 : vector<8x32xf32>
    %cst_107 = arith.constant 1.000000e+00 : f32
    %268 = vector.broadcast %cst_107 : f32 to vector<8x32xf32>
    %269 = arith.addf %268, %267 : vector<8x32xf32>
    %270 = arith.divf %268, %269 : vector<8x32xf32>
    %271 = arith.mulf %259, %270 : vector<8x32xf32>
    %cst_108 = arith.constant 0.000000e+00 : f32
    %272 = vector.broadcast %cst_108 : f32 to vector<1x14x32xf32>
    %c0_109 = arith.constant 0 : index
    %c0_110 = arith.constant 0 : index
    %c0_111 = arith.constant 0 : index
    %273 = vector.load %arg9[%c0_109, %c0_110, %c0_111] : memref<1x14x32xf32, #tpu.memory_space<vmem>>, vector<1x14x32xf32>
    tpu.vector_store %arg9[%c0_109, %c0_110, %c0_111], %272 {strides = array<i32>} : memref<1x14x32xf32, #tpu.memory_space<vmem>>, vector<1x14x32xf32>,
    %274 = vector.shape_cast %271 : vector<8x32xf32> to vector<1x8x32xf32>
    %c0_112 = arith.constant 0 : index
    %c3_113 = arith.constant 3 : index
    %c0_114 = arith.constant 0 : index
    %275 = vector.load %arg9[%c0_112, %c3_113, %c0_114] : memref<1x14x32xf32, #tpu.memory_space<vmem>>, vector<1x8x32xf32>
    tpu.vector_store %arg9[%c0_112, %c3_113, %c0_114], %274 {strides = array<i32>} : memref<1x14x32xf32, #tpu.memory_space<vmem>>, vector<1x8x32xf32>,
    %cst_115 = arith.constant 0.000000e+00 : f32
    %276 = vector.broadcast %cst_115 : f32 to vector<1x8x32xf32>
    %c0_116 = arith.constant 0 : index
    %c0_117 = arith.constant 0 : index
    %c0_118 = arith.constant 0 : index
    %277 = vector.load %arg9[%c0_116, %c0_117, %c0_118] : memref<1x14x32xf32, #tpu.memory_space<vmem>>, vector<1x8x32xf32>
    %c25 = arith.constant 25 : index
    %c0_119 = arith.constant 0 : index
    %278 = vector.load %arg5[%c25, %c0_119] : memref<32x64xf32, #tpu.memory_space<vmem>>, vector<1x32xf32>
    %279 = vector.shape_cast %278 : vector<1x32xf32> to vector<1x1x32xf32>
    %280 = vector.broadcast %279 : vector<1x1x32xf32> to vector<1x8x32xf32>
    %281 = arith.mulf %277, %280 : vector<1x8x32xf32>
    %282 = arith.addf %276, %281 : vector<1x8x32xf32>
    %c0_120 = arith.constant 0 : index
    %c1_121 = arith.constant 1 : index
    %c0_122 = arith.constant 0 : index
    %283 = vector.load %arg9[%c0_120, %c1_121, %c0_122] : memref<1x14x32xf32, #tpu.memory_space<vmem>>, vector<1x8x32xf32>
    %c26 = arith.constant 26 : index
    %c0_123 = arith.constant 0 : index
    %284 = vector.load %arg5[%c26, %c0_123] : memref<32x64xf32, #tpu.memory_space<vmem>>, vector<1x32xf32>
    %285 = vector.shape_cast %284 : vector<1x32xf32> to vector<1x1x32xf32>
    %286 = vector.broadcast %285 : vector<1x1x32xf32> to vector<1x8x32xf32>
    %287 = arith.mulf %283, %286 : vector<1x8x32xf32>
    %288 = arith.addf %282, %287 : vector<1x8x32xf32>
    %c0_124 = arith.constant 0 : index
    %c2_125 = arith.constant 2 : index
    %c0_126 = arith.constant 0 : index
    %289 = vector.load %arg9[%c0_124, %c2_125, %c0_126] : memref<1x14x32xf32, #tpu.memory_space<vmem>>, vector<1x8x32xf32>
    %c27 = arith.constant 27 : index
    %c0_127 = arith.constant 0 : index
    %290 = vector.load %arg5[%c27, %c0_127] : memref<32x64xf32, #tpu.memory_space<vmem>>, vector<1x32xf32>
    %291 = vector.shape_cast %290 : vector<1x32xf32> to vector<1x1x32xf32>
    %292 = vector.broadcast %291 : vector<1x1x32xf32> to vector<1x8x32xf32>
    %293 = arith.mulf %289, %292 : vector<1x8x32xf32>
    %294 = arith.addf %288, %293 : vector<1x8x32xf32>
    %c0_128 = arith.constant 0 : index
    %c3_129 = arith.constant 3 : index
    %c0_130 = arith.constant 0 : index
    %295 = vector.load %arg9[%c0_128, %c3_129, %c0_130] : memref<1x14x32xf32, #tpu.memory_space<vmem>>, vector<1x8x32xf32>
    %c28 = arith.constant 28 : index
    %c0_131 = arith.constant 0 : index
    %296 = vector.load %arg5[%c28, %c0_131] : memref<32x64xf32, #tpu.memory_space<vmem>>, vector<1x32xf32>
    %297 = vector.shape_cast %296 : vector<1x32xf32> to vector<1x1x32xf32>
    %298 = vector.broadcast %297 : vector<1x1x32xf32> to vector<1x8x32xf32>
    %299 = arith.mulf %295, %298 : vector<1x8x32xf32>
    %300 = arith.addf %294, %299 : vector<1x8x32xf32>
    %c0_132 = arith.constant 0 : index
    %c4_133 = arith.constant 4 : index
    %c0_134 = arith.constant 0 : index
    %301 = vector.load %arg9[%c0_132, %c4_133, %c0_134] : memref<1x14x32xf32, #tpu.memory_space<vmem>>, vector<1x8x32xf32>
    %c29 = arith.constant 29 : index
    %c0_135 = arith.constant 0 : index
    %302 = vector.load %arg5[%c29, %c0_135] : memref<32x64xf32, #tpu.memory_space<vmem>>, vector<1x32xf32>
    %303 = vector.shape_cast %302 : vector<1x32xf32> to vector<1x1x32xf32>
    %304 = vector.broadcast %303 : vector<1x1x32xf32> to vector<1x8x32xf32>
    %305 = arith.mulf %301, %304 : vector<1x8x32xf32>
    %306 = arith.addf %300, %305 : vector<1x8x32xf32>
    %c0_136 = arith.constant 0 : index
    %c5_137 = arith.constant 5 : index
    %c0_138 = arith.constant 0 : index
    %307 = vector.load %arg9[%c0_136, %c5_137, %c0_138] : memref<1x14x32xf32, #tpu.memory_space<vmem>>, vector<1x8x32xf32>
    %c30 = arith.constant 30 : index
    %c0_139 = arith.constant 0 : index
    %308 = vector.load %arg5[%c30, %c0_139] : memref<32x64xf32, #tpu.memory_space<vmem>>, vector<1x32xf32>
    %309 = vector.shape_cast %308 : vector<1x32xf32> to vector<1x1x32xf32>
    %310 = vector.broadcast %309 : vector<1x1x32xf32> to vector<1x8x32xf32>
    %311 = arith.mulf %307, %310 : vector<1x8x32xf32>
    %312 = arith.addf %306, %311 : vector<1x8x32xf32>
    %c0_140 = arith.constant 0 : index
    %c6_141 = arith.constant 6 : index
    %c0_142 = arith.constant 0 : index
    %313 = vector.load %arg9[%c0_140, %c6_141, %c0_142] : memref<1x14x32xf32, #tpu.memory_space<vmem>>, vector<1x8x32xf32>
    %c31 = arith.constant 31 : index
    %c0_143 = arith.constant 0 : index
    %314 = vector.load %arg5[%c31, %c0_143] : memref<32x64xf32, #tpu.memory_space<vmem>>, vector<1x32xf32>
    %315 = vector.shape_cast %314 : vector<1x32xf32> to vector<1x1x32xf32>
    %316 = vector.broadcast %315 : vector<1x1x32xf32> to vector<1x8x32xf32>
    %317 = arith.mulf %313, %316 : vector<1x8x32xf32>
    %318 = arith.addf %312, %317 : vector<1x8x32xf32>
    %319 = vector.shape_cast %318 : vector<1x8x32xf32> to vector<8x32xf32>
    %c15 = arith.constant 15 : index
    %c0_144 = arith.constant 0 : index
    %320 = vector.load %arg5[%c15, %c0_144] : memref<32x64xf32, #tpu.memory_space<vmem>>, vector<1x32xf32>
    %321 = vector.broadcast %320 : vector<1x32xf32> to vector<8x32xf32>
    %322 = arith.addf %319, %321 : vector<8x32xf32>
    %c18 = arith.constant 18 : index
    %c0_145 = arith.constant 0 : index
    %323 = vector.load %arg5[%c18, %c0_145] : memref<32x64xf32, #tpu.memory_space<vmem>>, vector<1x32xf32>
    %324 = vector.broadcast %323 : vector<1x32xf32> to vector<8x32xf32>
    %325 = arith.subf %322, %324 : vector<8x32xf32>
    %c19 = arith.constant 19 : index
    %c0_146 = arith.constant 0 : index
    %326 = vector.load %arg5[%c19, %c0_146] : memref<32x64xf32, #tpu.memory_space<vmem>>, vector<1x32xf32>
    %cst_147 = arith.constant 9.99999974E-6 : f32
    %327 = vector.broadcast %cst_147 : f32 to vector<1x32xf32>
    %328 = arith.addf %326, %327 : vector<1x32xf32>
    %329 = math.rsqrt %328 : vector<1x32xf32>
    %330 = vector.broadcast %329 : vector<1x32xf32> to vector<8x32xf32>
    %331 = arith.mulf %325, %330 : vector<8x32xf32>
    %c16 = arith.constant 16 : index
    %c0_148 = arith.constant 0 : index
    %332 = vector.load %arg5[%c16, %c0_148] : memref<32x64xf32, #tpu.memory_space<vmem>>, vector<1x32xf32>
    %333 = vector.broadcast %332 : vector<1x32xf32> to vector<8x32xf32>
    %334 = arith.mulf %331, %333 : vector<8x32xf32>
    %c17 = arith.constant 17 : index
    %c0_149 = arith.constant 0 : index
    %335 = vector.load %arg5[%c17, %c0_149] : memref<32x64xf32, #tpu.memory_space<vmem>>, vector<1x32xf32>
    %336 = vector.broadcast %335 : vector<1x32xf32> to vector<8x32xf32>
    %337 = arith.addf %334, %336 : vector<8x32xf32>
    %338 = arith.negf %337 : vector<8x32xf32>
    %339 = math.exp %338 : vector<8x32xf32>
    %cst_150 = arith.constant 1.000000e+00 : f32
    %340 = vector.broadcast %cst_150 : f32 to vector<8x32xf32>
    %341 = arith.addf %340, %339 : vector<8x32xf32>
    %342 = arith.divf %340, %341 : vector<8x32xf32>
    %343 = arith.mulf %337, %342 : vector<8x32xf32>
    %c320 = arith.constant 320 : index
    %c0_151 = arith.constant 0 : index
    %344 = vector.load %arg6[%c320, %c0_151] : memref<352x64xbf16, #tpu.memory_space<vmem>>, vector<32x32xbf16>
    %345 = arith.truncf %343 : vector<8x32xf32> to vector<8x32xbf16>
    %cst_152 = arith.constant dense<0.000000e+00> : vector<8x32xf32>
    %346 = tpu.matmul %345, %344, %cst_152 {dimension_numbers = #tpu.dot_dimension_numbers<[1], [0], [0], [1], [0, 0, 1, 1], [], []>} : vector<8x32xbf16>, vector<32x32xbf16>, vector<8x32xf32> -> vector<8x32xf32>
    %347 = arith.addf %229, %346 : vector<8x32xf32>
    %c20 = arith.constant 20 : index
    %c0_153 = arith.constant 0 : index
    %348 = vector.load %arg5[%c20, %c0_153] : memref<32x64xf32, #tpu.memory_space<vmem>>, vector<1x32xf32>
    %349 = vector.broadcast %348 : vector<1x32xf32> to vector<8x32xf32>
    %350 = arith.addf %347, %349 : vector<8x32xf32>
    %cst_154 = arith.constant dense<0.000000e+00> : vector<8xf32>
    %351 = vector.multi_reduction <add>, %350, %cst_154 [1] : vector<8x32xf32> to vector<8xf32>
    %352 = vector.shape_cast %351 : vector<8xf32> to vector<8x1xf32>
    %cst_155 = arith.constant 3.200000e+01 : f32
    %353 = vector.broadcast %cst_155 : f32 to vector<8x1xf32>
    %354 = arith.divf %352, %353 : vector<8x1xf32>
    %355 = vector.broadcast %354 : vector<8x1xf32> to vector<8x32xf32>
    %356 = arith.subf %350, %355 : vector<8x32xf32>
    %357 = arith.mulf %356, %356 : vector<8x32xf32>
    %cst_156 = arith.constant dense<0.000000e+00> : vector<8xf32>
    %358 = vector.multi_reduction <add>, %357, %cst_156 [1] : vector<8x32xf32> to vector<8xf32>
    %359 = vector.shape_cast %358 : vector<8xf32> to vector<8x1xf32>
    %cst_157 = arith.constant 3.200000e+01 : f32
    %360 = vector.broadcast %cst_157 : f32 to vector<8x1xf32>
    %361 = arith.divf %359, %360 : vector<8x1xf32>
    %362 = vector.broadcast %354 : vector<8x1xf32> to vector<8x32xf32>
    %363 = arith.subf %350, %362 : vector<8x32xf32>
    %cst_158 = arith.constant 9.99999974E-6 : f32
    %364 = vector.broadcast %cst_158 : f32 to vector<8x1xf32>
    %365 = arith.addf %361, %364 : vector<8x1xf32>
    %366 = math.rsqrt %365 : vector<8x1xf32>
    %367 = vector.broadcast %366 : vector<8x1xf32> to vector<8x32xf32>
    %368 = arith.mulf %363, %367 : vector<8x32xf32>
    %c21 = arith.constant 21 : index
    %c0_159 = arith.constant 0 : index
    %369 = vector.load %arg5[%c21, %c0_159] : memref<32x64xf32, #tpu.memory_space<vmem>>, vector<1x32xf32>
    %370 = vector.broadcast %369 : vector<1x32xf32> to vector<8x32xf32>
    %371 = arith.mulf %368, %370 : vector<8x32xf32>
    %c22 = arith.constant 22 : index
    %c0_160 = arith.constant 0 : index
    %372 = vector.load %arg5[%c22, %c0_160] : memref<32x64xf32, #tpu.memory_space<vmem>>, vector<1x32xf32>
    %373 = vector.broadcast %372 : vector<1x32xf32> to vector<8x32xf32>
    %374 = arith.addf %371, %373 : vector<8x32xf32>
    %cst_161 = arith.constant dense<0.000000e+00> : vector<8xf32>
    %375 = vector.multi_reduction <add>, %374, %cst_161 [1] : vector<8x32xf32> to vector<8xf32>
    %376 = vector.shape_cast %375 : vector<8xf32> to vector<8x1xf32>
    %cst_162 = arith.constant 3.200000e+01 : f32
    %377 = vector.broadcast %cst_162 : f32 to vector<8x1xf32>
    %378 = arith.divf %376, %377 : vector<8x1xf32>
    %379 = vector.broadcast %378 : vector<8x1xf32> to vector<8x32xf32>
    %380 = arith.subf %374, %379 : vector<8x32xf32>
    %381 = arith.mulf %380, %380 : vector<8x32xf32>
    %cst_163 = arith.constant dense<0.000000e+00> : vector<8xf32>
    %382 = vector.multi_reduction <add>, %381, %cst_163 [1] : vector<8x32xf32> to vector<8xf32>
    %383 = vector.shape_cast %382 : vector<8xf32> to vector<8x1xf32>
    %cst_164 = arith.constant 3.200000e+01 : f32
    %384 = vector.broadcast %cst_164 : f32 to vector<8x1xf32>
    %385 = arith.divf %383, %384 : vector<8x1xf32>
    %386 = vector.broadcast %378 : vector<8x1xf32> to vector<8x32xf32>
    %387 = arith.subf %374, %386 : vector<8x32xf32>
    %cst_165 = arith.constant 9.99999974E-6 : f32
    %388 = vector.broadcast %cst_165 : f32 to vector<8x1xf32>
    %389 = arith.addf %385, %388 : vector<8x1xf32>
    %390 = math.rsqrt %389 : vector<8x1xf32>
    %391 = vector.broadcast %390 : vector<8x1xf32> to vector<8x32xf32>
    %392 = arith.mulf %387, %391 : vector<8x32xf32>
    %c23 = arith.constant 23 : index
    %c0_166 = arith.constant 0 : index
    %393 = vector.load %arg5[%c23, %c0_166] : memref<32x64xf32, #tpu.memory_space<vmem>>, vector<1x32xf32>
    %394 = vector.broadcast %393 : vector<1x32xf32> to vector<8x32xf32>
    %395 = arith.mulf %392, %394 : vector<8x32xf32>
    %c24 = arith.constant 24 : index
    %c0_167 = arith.constant 0 : index
    %396 = vector.load %arg5[%c24, %c0_167] : memref<32x64xf32, #tpu.memory_space<vmem>>, vector<1x32xf32>
    %397 = vector.broadcast %396 : vector<1x32xf32> to vector<8x32xf32>
    %398 = arith.addf %395, %397 : vector<8x32xf32>
    %399 = vector.shape_cast %398 : vector<8x32xf32> to vector<1x8x32xf32>
    %c0_168 = arith.constant 0 : index
    %c0_169 = arith.constant 0 : index
    %c0_170 = arith.constant 0 : index
    %400 = vector.load %arg7[%c0_168, %c0_169, %c0_170] : memref<1x8x32xf32, #tpu.memory_space<vmem>>, vector<1x8x32xf32>
    tpu.vector_store %arg7[%c0_168, %c0_169, %c0_170], %399 {strides = array<i32>} : memref<1x8x32xf32, #tpu.memory_space<vmem>>, vector<1x8x32xf32>,
    return
  }
  func.func @transform_0(%arg0: i32) -> (i32, i32, i32) {
    %c0_i32 = arith.constant 0 : i32
    %c0_i32_0 = arith.constant 0 : i32
    %c0_i32_1 = arith.constant 0 : i32
    return %arg0, %c0_i32, %c0_i32_0 : i32, i32, i32
  }
  func.func @transform_1(%arg0: i32) -> (i32, i32, i32) {
    %c0_i32 = arith.constant 0 : i32
    %c0_i32_0 = arith.constant 0 : i32
    %c0_i32_1 = arith.constant 0 : i32
    return %arg0, %c0_i32, %c0_i32_0 : i32, i32, i32
  }
  func.func @transform_2(%arg0: i32) -> (i32, i32, i32, i32) {
    %c0_i32 = arith.constant 0 : i32
    %c0_i32_0 = arith.constant 0 : i32
    %c0_i32_1 = arith.constant 0 : i32
    %c0_i32_2 = arith.constant 0 : i32
    %c0_i32_3 = arith.constant 0 : i32
    return %c0_i32, %c0_i32_0, %c0_i32_1, %c0_i32_2 : i32, i32, i32, i32
  }
  func.func @transform_3(%arg0: i32) -> (i32, i32, i32, i32) {
    %c0_i32 = arith.constant 0 : i32
    %c0_i32_0 = arith.constant 0 : i32
    %c0_i32_1 = arith.constant 0 : i32
    %c0_i32_2 = arith.constant 0 : i32
    %c0_i32_3 = arith.constant 0 : i32
    return %c0_i32, %c0_i32_0, %c0_i32_1, %c0_i32_2 : i32, i32, i32, i32
  }
  func.func @transform_4(%arg0: i32) -> (i32, i32) {
    %c0_i32 = arith.constant 0 : i32
    %c0_i32_0 = arith.constant 0 : i32
    %c0_i32_1 = arith.constant 0 : i32
    return %c0_i32, %c0_i32_0 : i32, i32
  }
  func.func @transform_5(%arg0: i32) -> (i32, i32) {
    %c0_i32 = arith.constant 0 : i32
    %c0_i32_0 = arith.constant 0 : i32
    %c0_i32_1 = arith.constant 0 : i32
    return %c0_i32, %c0_i32_0 : i32, i32
  }
  func.func @transform_6(%arg0: i32) -> (i32, i32, i32) {
    %c0_i32 = arith.constant 0 : i32
    %c0_i32_0 = arith.constant 0 : i32
    %c0_i32_1 = arith.constant 0 : i32
    return %arg0, %c0_i32, %c0_i32_0 : i32, i32, i32
  }
  func.func @transform_7(%arg0: i32) -> (i32, i32, i32) {
    %c0_i32 = arith.constant 0 : i32
    %c0_i32_0 = arith.constant 0 : i32
    %c0_i32_1 = arith.constant 0 : i32
    return %arg0, %c0_i32, %c0_i32_0 : i32, i32, i32
  }
}

</mosaic_0001>

<bundles_post_ra>
// kernel: tpu_custom_call.1
= control target key start
LH: loop header
LB: loop body
LE: loop exit
PB: predicated region body
PF: predicated region fallthrough
CT: control target
= control target key end

     0   :  { %13 = vsyncpa [#allocation4], 0  ;;  %s3591_s0 = inlined_call_operand.vmem [shape: f32[2,8,32], index: 0, kind: input, shape index: {}]   ;;  %s3592_s1 = inlined_call_operand.hbm [shape: f32[8,1,8], index: 1, kind: input, shape index: {}]   ;;  %s3593_s2 = inlined_call_operand.vmem [shape: f32[8,4,8,8], index: 2, kind: input, shape index: {}]   ;;  %s3594_s3 = inlined_call_operand.vmem [shape: f32[2,4,1,8], index: 3, kind: input, shape index: {}]   ;;  %s3595_s4 = inlined_call_operand.hbm [shape: f32[32,64], index: 4, kind: input, shape index: {}]   ;;  %s3596_s5 = inlined_call_operand.vmem [shape: bf16[352,64], index: 5, kind: input, shape index: {}]   ;;  %s3597_s6 = inlined_call_operand.hbm [shape: f32[2,8,32], index: 6, kind: output, shape index: {0}]   ;;  %s3598_s7 = inlined_call_operand.hbm [shape: f32[8,8,8], index: 7, kind: output, shape index: {1}]  }
   0x1   :  { %15 = vsyncpa [#allocation4 + $0x1], 0 }
   0x2   :  { %16 = vsyncpa [#allocation7], 0 }
   0x3   :  { %17 = vsyncpa [#allocation5], 0 }
   0x4   :  { %19 = vsyncpa [#allocation5 + $0x1], 0 }
   0x5   :  { %20 = vsyncpa [#allocation10], 0 }
   0x6   :  { %22 = vsyncpa [#allocation10 + $0x1], 0  ;;  %s2940_s24 = smov 0   ;;  %s2942_s25 = smov 0  }
   0x7   :  { %s2944_s26 = smov 0   ;;  %s2946_s27 = smov 0  }
   0x8 LB: > { %s2961_s28 = sadd.s32 4294967295, %s2873_s27   ;;  %s2222_s29 = sadd.s32 4294967294, %s2873_s27   ;;  %s2873_s27 = sphi %s2946_s27, %s3620_s27   ;;  %s2869_s26 = sphi %s2944_s26, %s3619_s26   ;;  %s2865_s25 = sphi %s2942_s25, %s3618_s25   ;;  %s2861_s24 = sphi %s2940_s24, %s3617_s24  }
   0x9   : > { %p74_p0 = scmp.ne.s32.totalorder %s2865_s25, %s2861_s24  ;;  %p3599_p1 = scmp.eq.s32.totalorder %s2961_s28, 0 }
   0xa   : > { %p188_p3 = scmp.eq.s32.totalorder %s2222_s29, 1  ;;  %p2223_p5 = scmp.ge.s32.totalorder %s2873_s27, 1 }
   0xb   : > { %p2970_p4 = por %p3599_p1, %p74_p0  ;;  %p221_p7 = scmp.lt.s32.totalorder %s2873_s27, 3 }
   0xc   : > { %p2975_p6 = por %p188_p3, %p74_p0  ;;  %s2875_s10 = smov [#allocation6]  }
   0xd   : > { %s3603_s30 = scalar_select %p2970_p4, 1, 0 }
   0xe   : > { %s3604_s8 = scalar_select %p2975_p6, 1, 0 }
   0xf   : > { %p2980_p8 = pnand %p2223_p5, %p221_p7  ;;  %s239_s11 = sshll.u32 %s2875_s10, 4  ;;  %s2984_s11 = int_to_ptr.vmem [resolvable:$true] %s239_s11 }
  0x10   : > { %s2996_s13 = sadd.s32 1, %s2873_s27   ;;  %s61_s14 = sadd.s32 1, %s2869_s26 }
  0x11   : > { %s3605_s9 = scalar_select %p2980_p8, 1, 0 }
  0x12   : > { %p2548_p9 = pneg %p2980_p8  ;;  %s58_s15 = ssub.s32 %s2873_s27, %s2996_s13 }
  0x13   : > { %s2713_s18 = scalar_lea.hbm %s3595_s4, 512 }
  0x14   : > { %p2991_p11 = pnand %p2548_p9, %p3599_p1  ;;  %p2714_p12 = scmp.ne.s32.totalorder %s3595_s4, %s2713_s18 }
  0x15   : > { %p2720_p5 = scmp.lt.u32.totalorder %s2713_s18, %s3595_s4 }
  0x16   : > { %p2715_p13 = pneg %p2991_p11 }
  0x18   : > { %p2716_p0 = pnand %p2715_p13, %p2714_p12 }
  0x1a   : > { %p2717_p3 = pneg %p2716_p0 }
  0x1c   : > { %p2722_p7 = pnand %p2720_p5, %p2717_p3 }
  0x1e   : > { %2725 = shalt.err (!%p2722_p7)
}
  0x1f   : > { %s2726_s23 = scalar_lea.vmem %s2984_s11, 512  ;;  %p2734_p2 = scmp.lt.s32.totalorder %s2984_s11, %s2984_s11 }
  0x20   : > { %p2727_p9 = scmp.ne.s32.totalorder %s2984_s11, %s2726_s23  ;;  %p2735_p6 = scmp.lt.s32.totalorder %s2726_s23, %s2726_s23 }
  0x22   : > { %p2729_p10 = pnand %p2727_p9, %p2715_p13  ;;  %p2736_p4 = por %p2735_p6, %p2734_p2 }
  0x24   : > { %p2730_p1 = pneg %p2729_p10 }
  0x26   : > { %p2737_p8 = pnand %p2736_p4, %p2730_p1 }
  0x28   : > { %2740 = shalt.err (!%p2737_p8)
}
  0x29   : > { %s2876_s29 = smov 128   ;;  %s2877_s10 = smov 8  }
  0x2a   : > { %2551 = dma.hbm_to_vmem [thread:$0]  (!%p2991_p11), %s3595_s4, 512, %s2984_s11, [#allocation7], %s2876_s29, %s2876_s29, %s2877_s10  }
  0x2b   : > { %p59_p2 = scmp.eq.s32.totalorder %s58_s15, 0  ;;  %p68_p1 = scmp.ne.s32.totalorder %s2869_s26, %s2865_s25 }
  0x2c   : > { %p69_p4 = scmp.eq.s32.totalorder %s2873_s27, 0  ;;  %p2564_p6 = scmp.lt.s32.totalorder %s2873_s27, 2 }
  0x2d   : > { %s3027_s18 = scalar_select %p59_p2, %s2869_s26, %s61_s14  }
  0x2e   : > { %p70_p8 = por %p69_p4, %p68_p1  ;;  %p3607_p10 = scmp.eq.s32.totalorder %s2961_s28, 1 }
  0x2f   : > { %s263_s20 = sand.u32 1, %s2869_s26   ;;  %s2356_s21 = sshll.u32 %s2873_s27, 6 }
  0x30   : > { %p3031_p12 = por %p3607_p10, %p68_p1  ;;  %s2226_s22 = sshll.u32 %s263_s20, 2 }
  0x31   : > { %s3040_s16 = scalar_lea.hbm %s3592_s1, %s2356_s21  ;;  %s267_s11 = scalar_lea.vmem [#allocation3], %s2226_s22 }
  0x32   : > { %s274_s14 = sshll.u32 %s267_s11, 4  ;;  %p3042_p11 = pnand %p2564_p6, %p70_p8  ;;  %s3046_s14 = int_to_ptr.vmem [resolvable:$true] %s274_s14 }
  0x33   : > { %s3048_s29 = scalar_lea.sflag [#allocation4], %s263_s20  ;;  %s2741_s10 = scalar_lea.hbm %s3040_s16, 64 }
  0x34   : > { %p2742_p13 = scmp.ne.s32.totalorder %s3040_s16, %s2741_s10  ;;  %p2743_p0 = pneg %p3042_p11 }
  0x35   : > { %s2746_s22 = scalar_lea.hbm %s3592_s1, 128  ;;  %p2747_p7 = scmp.lt.u32.totalorder %s3040_s16, %s3592_s1 }
  0x36   : > { %p2744_p3 = pnand %p2743_p0, %p2742_p13  ;;  %p2748_p9 = scmp.lt.u32.totalorder %s2746_s22, %s2741_s10 }
  0x37   : > { %p2750_p1 = scmp.lt.u32.totalorder %s2741_s10, %s3040_s16 }
  0x38   : > { %p2745_p5 = pneg %p2744_p3  ;;  %p2749_p2 = por %p2748_p9, %p2747_p7 }
  0x3a   : > { %p2751_p4 = por %p2750_p1, %p2749_p2 }
  0x3c   : > { %p2752_p6 = pnand %p2751_p4, %p2745_p5 }
  0x3e   : > { %2755 = shalt.err (!%p2752_p6)
}
  0x3f   : > { %s2756_s20 = scalar_lea.vmem %s3046_s14, 64  ;;  %s2878_s11 = smov [#allocation3]  }
  0x40   : > { %p2757_p8 = scmp.ne.s32.totalorder %s3046_s14, %s2756_s20  ;;  %s2761_s17 = sshll.u32 %s2878_s11, 4  ;;  %s2762_s17 = int_to_ptr.vmem [resolvable:$false] %s2761_s17 }
  0x41   : > { %s2763_s21 = scalar_lea.vmem %s2762_s17, 128  ;;  %p2764_p3 = scmp.lt.s32.totalorder %s3046_s14, %s2762_s17 }
  0x42   : > { %p2759_p10 = pnand %p2757_p8, %p2743_p0  ;;  %p2765_p7 = scmp.lt.s32.totalorder %s2763_s21, %s2756_s20 }
  0x44   : > { %p2760_p13 = pneg %p2759_p10  ;;  %p2766_p9 = por %p2765_p7, %p2764_p3 }
  0x46   : > { %p2767_p2 = pnand %p2766_p9, %p2760_p13 }
  0x48   : > { %2770 = shalt.err (!%p2767_p2)
}
  0x49   : > { %s2879_s10 = smov 16   ;;  %s2880_s22 = smov 1  }
  0x4a   : > { %2555 = dma.hbm_to_vmem [thread:$0]  (!%p3042_p11), %s3040_s16, 64, %s3046_s14, %s3048_s29, %s2879_s10, %s2879_s10, %s2880_s22  }
  0x4b   : > { %p3610_p0 = scmp.ne.s32.totalorder %s3605_s9, 0 }
  0x4c   : > { %s3079_s12 = sand.u32 (!%p3610_p0), 1, %s2865_s25   ;;  %p3611_p5 = scmp.ne.s32.totalorder (!%p3610_p0), %s3603_s30, 0 }
  0x4d   : > { %286 = sbr.rel (%p3610_p0) target bundleno = 4144 (0x1030), region = 44  ;;  %s2230_s23 = sshll.u32 (!%p3610_p0), %s3079_s12, 2 }
  0x4e   : > { %s289_s20 = scalar_lea.sflag (!%p3610_p0), [#allocation4], %s3079_s12  ;;  %s3083_s11 = scalar_lea.vmem (!%p3610_p0), [#allocation3], %s2230_s23 }
  0x54   : > { %2844 = dma.done.wait (%p3611_p5), %s289_s20, 64  }
  0x55   : > { %2846 = vsyncadd (%p3611_p5), %s289_s20, 4294967232  ;;  %p3612_p11 = scmp.eq.s32.totalorder %s2961_s28, 0 }
  0x57   : > { %2848 = dma.done.wait (%p3612_p11), [#allocation7], 512   ;;  %p3613_p1 = pmov %p3612_p11 }
  0x58   : > { %p336_p4 = scmp.lt.s32.totalorder %s2961_s28, 1  ;;  %vm344_vm0 = vcmask 261120   ;;  %v2651_v7 = vld [vmem:[%s3596_s5] sm:$0xff]   ;;  %v2652_v8 = vld [vmem:[%s3596_s5 + $0x10] sm:$0xff]   ;;  %v2881_v9 = vmov 0.0   ;;  %v2653_v10 = vld [vmem:[%s3596_s5 + $0x8] sm:$0xff]  }
  0x59   : > { %2850 = vsyncadd (%p3613_p1), [#allocation7], 4294966784  ;;  %2406 = vmatprep.subr.bf16.mxu0 %v2881_v9  ;;  %1846 = vst.msk [vmem:[#allocation2] sm:$0xff] %vm344_vm0, %v2881_v9  ;;  %2414 = vmatprep.subr.bf16.mxu1 %v2881_v9  ;;  %v2654_v11 = vld [vmem:[%s3596_s5 + $0x18] sm:$0xff]   ;;  %vm2882_vm1 = vmmov 0   ;;  %v2655_v22 = vld [vmem:[%s3596_s5 + $0x20] sm:$0xff]  }
  0x5a   : > { %s337_s9 = scalar_select %p336_p4, %s2961_s28, 1  ;;  %2407 = vmatpush3.bf16.msra.mxu0 %v2651_v7  ;;  %2415 = vmatpush3.bf16.msra.mxu1 %v2652_v8  ;;  %v2235_v16 = vld [vmem:[#allocation6] ss:$0 sm:$0xff]  ;;  %v2236_v18 = vld [vmem:[#allocation6 + $0x1] ss:$0 sm:$0xff]  ;;  %v2656_v23 = vld [vmem:[%s3596_s5 + $0x28] sm:$0xff]  }
  0x5b   : > { %2408 = vmatprep.subr.bf16.mxu0 %v2881_v9  ;;  %2416 = vmatprep.subr.bf16.mxu1 %v2881_v9  ;;  %v2657_v24 = vld [vmem:[%s3596_s5 + $0x30] sm:$0xff]   ;;  %v2658_v25 = vld [vmem:[%s3596_s5 + $0x38] sm:$0xff]   ;;  %vm542_vm2 = vcmask 523264   ;;  %v2659_v58 = vld [vmem:[%s3596_s5 + $0x40] sm:$0xff]   ;;  %s2885_s22 = smov 120   ;;  %vm1138_vm3 = vcmask 64512  }
  0x5c   : > { %s2234_s16 = sshll.u32 %s337_s9, 3  ;;  %2410 = vmatprep.mubr.msk.bf16.mxu0 %vm2882_vm1, %v2881_v9  ;;  %2418 = vmatprep.mubr.msk.bf16.mxu1 %vm2882_vm1, %v2881_v9  ;;  %v2241_v26 = vld [vmem:[#allocation6 + $0x3] ss:$0 sm:$0xff]  ;;  %v2237_v39 = vld [vmem:[#allocation6 + $0x2] ss:$0 sm:$0xff]  ;;  %v2660_v59 = vld [vmem:[%s3596_s5 + $0x60] sm:$0xff]  }
  0x5d   : > { %s339_s29 = scalar_lea.vmem %s3591_s0, %s2234_s16  ;;  %v2246_v44 = vld [vmem:[#allocation6 + $0x4] ss:$0 sm:$0xff]  ;;  %v2661_v60 = vld [vmem:[%s3596_s5 + $0x48] sm:$0xff]   ;;  %v2663_v7 = vld [vmem:[%s3596_s5 + $0x50] sm:$0xff]   ;;  %s2886_s23 = smov 112   ;;  %vm1422_vm4 = vcmask 1043456  }
  0x5e   : > { %v3098_v0 = vld [vmem:[%s339_s29] sm:$0xff]  ;;  %2409 = vmatpush3.bf16.msra.mxu0 %v2653_v10  ;;  %2417 = vmatpush3.bf16.msra.mxu1 %v2654_v11  ;;  %v2662_v61 = vld [vmem:[%s3596_s5 + $0x68] sm:$0xff]   ;;  %v2664_v10 = vld [vmem:[%s3596_s5 + $0x58] sm:$0xff]   ;;  %v2883_v11 = vmov 0   ;;  %s3602_s15 = smov 104   ;;  %s2233_s16 = sshll.u32 %s3079_s12, 5 }
  0x5f   : > { %v345_v1 = vsel %vm344_vm0, %v3098_v0, 0.0  ;;  %2422 = vmatprep.subr.bf16.mxu0 %v2881_v9  ;;  %2434 = vmatprep.subr.bf16.mxu1 %v2881_v9  ;;  %s3421_s14 = scalar_lea.vmem [#allocation9], %s2233_s16  ;;  %s2894_s30 = smov 16   ;;  %vm1617_vm13 = vcmask 130048   ;;  %vm1619_vm14 = vcmask 195584   ;;  %vm1847_vm15 = vcmask 259072  }
  0x60   : > { %346 = vadd.xlane.f32.xlu0 %v345_v1  ;;  %s2895_s17 = smov 8   ;;  %1848 = vst.msk [vmem:[#allocation2 + $0x8] sm:$0x3f] %vm1847_vm15, %v2881_v9  ;;  %s2357_s9 = sshll.u32 %s2961_s28, 9 }
  0x61   : > { %2621 = vset.pattern.permute.xlu0 %v2883_v11  ;;  %s2069_s29 = scalar_lea.sflag [#allocation10], %s3079_s12  ;;  %s2897_s21 = smov [#allocation9]  }
  0x62   : > { %s2775_s10 = sshll.u32 %s2897_s21, 4  ;;  %s2776_s10 = int_to_ptr.vmem [resolvable:$false] %s2775_s10 }
  0xed   : > { %v347_v2 = vpop.xlane.xlu0 %346 }
  0xee   : > { %v349_v3 = vmul.f32 0.03125, %v347_v2  ;;  %v2252_v2 = vld [vmem:[#allocation6 + $0x5] ss:$0 sm:$0xff] }
  0xf0   : > { %v350_v4 = vsub.f32 %v3098_v0, %v349_v3 }
  0xf2   : > { %v351_v5 = vmul.f32 %v350_v4, %v350_v4 }
  0xf4   : > { %v352_v6 = vsel %vm344_vm0, %v351_v5, 0.0 }
  0xf5   : > { %353 = vadd.xlane.f32.xlu0 %v352_v6 }
 0x182   : > { %v354_v12 = vpop.xlane.xlu0 %353 }
 0x183   : > { %v355_v13 = vmul.f32 0.03125, %v354_v12  ;;  %v2884_v12 = vmov 1  }
 0x184   : > { %2622 = vset.pattern.permute.xlu1 %v2884_v12 }
 0x185   : > { %v356_v14 = vadd.f32 1e-05, %v355_v13  ;;  %v2254_v13 = vld [vmem:[#allocation6 + $0x7] ss:$0 sm:$0xff] }
 0x187   : > { %2673 = vrsqrt.f32 %v356_v14 }
 0x191   : > { %v2674_v15 = vpop.eup %2673 }
 0x192   : > { %v358_v17 = vmul.f32 %v2674_v15, %v350_v4  ;;  %v2253_v4 = vld [vmem:[#allocation6 + $0x6] ss:$0 sm:$0xff] }
 0x194   : > { %v364_v19 = vmul.f32 %v2235_v16, %v358_v17 }
 0x196   : > { %v370_v20 = vadd.f32 %v2236_v18, %v364_v19 }
 0x198   : > { %v375_v21 = vpack.c.bf16 %v370_v20, %v370_v20 }
 0x19a   : > { %2411 = vmatmul.mubr.msk.bf16.vlgmr.msra.gmra.mrb[0].mxu0 %vm344_vm0, %v375_v21  ;;  %2419 = vmatmul.mubr.msk.bf16.vlgmr.msra.gmra.mrb[0].mxu1 %vm344_vm0, %v375_v21 }
 0x19b   : > { %2430 = vmatprep.mubr.msk.bf16.mxu0 %vm2882_vm1, %v2881_v9  ;;  %2438 = vmatprep.mubr.msk.bf16.mxu1 %vm2882_vm1, %v2881_v9 }
 0x19c   : > { %2423 = vmatpush3.bf16.msra.mxu0 %v2655_v22  ;;  %2435 = vmatpush3.bf16.msra.mxu1 %v2659_v58 }
 0x19d   : > { %2424 = vmatprep.subr.bf16.mxu0 %v2881_v9  ;;  %2436 = vmatprep.subr.bf16.mxu1 %v2881_v9 }
 0x1a0   : > { %2425 = vmatpush3.bf16.msra.mxu0 %v2656_v23  ;;  %2437 = vmatpush3.bf16.msra.mxu1 %v2661_v60  ;;  %v2258_v23 = vld [vmem:[#allocation6 + $0x8] ss:$0 sm:$0xff] }
 0x1a1   : > { %2426 = vmatprep.subr.bf16.mxu0 %v2881_v9  ;;  %2442 = vmatprep.subr.bf16.mxu1 %v2881_v9 }
 0x1a4   : > { %2427 = vmatpush3.bf16.msra.mxu0 %v2657_v24 }
 0x1a5   : > { %2428 = vmatprep.subr.bf16.mxu0 %v2881_v9 }
 0x1a8   : > { %2429 = vmatpush3.bf16.msra.mxu0 %v2658_v25 }
 0x1a9   : > { %2450 = vmatprep.subr.bf16.mxu0 %v2881_v9 }
 0x26d   : > { %v430_v27 = vpop.f32.mrb[0].mxu0  ;;  %v491_v28 = vpop.f32.mrb[0].mxu1 }
 0x26e   : > { %v492_v29 = vadd.f32 %v2241_v26, %v491_v28  ;;  %v2412_v30 = vpop.f32.mrb[1].mxu0  ;;  %v2420_v31 = vpop.f32.mrb[1].mxu1  ;;  %v431_v40 = vadd.f32 %v2237_v39, %v430_v27  ;;  %v2891_v39 = vmov 4  }
 0x26f   : > { %v433_v32 = vpop.f32.mrb[2].mxu0  ;;  %v494_v33 = vpop.f32.mrb[2].mxu1  ;;  %v2270_v30 = vld [vmem:[%s3594_s3] ss:$0 sm:$0xff] }
 0x270   : > { %v2245_v34 = vmul.f32 -1.442695, %v492_v29  ;;  %v2413_v35 = vpop.f32.mrb[3].mxu0  ;;  %v2421_v36 = vpop.f32.mrb[3].mxu1  ;;  %v2274_v32 = vld [vmem:[%s3594_s3 + $0x4] ss:$0 sm:$0xff] }
 0x271   : > { %v2888_v36 = vmov 3  }
 0x272   : > { %2675 = vpow2.f32 %v2245_v34 }
 0x27c   : > { %v2676_v37 = vpop.eup %2675 }
 0x27d   : > { %v500_v38 = vadd.f32 1.0, %v2676_v37  ;;  %v2889_v37 = vmov 2  }
 0x27f   : > { %2677 = vrcp.f32 %v500_v38  ;;  %v2890_v38 = vmov 5  }
 0x289   : > { %v2678_v41 = vpop.eup %2677 }
 0x28a   : > { %v503_v42 = vmul.f32 %v2678_v41, %v431_v40  ;;  %v2892_v40 = vmov 6   ;;  %v2893_v41 = vmov 7  }
 0x28c   : > { %v512_v43 = vpack.c.bf16 %v503_v42, %v503_v42  ;;  %v2275_v42 = vld [vmem:[%s3594_s3 + $0x5] ss:$0 sm:$0xff] }
 0x28e   : > { %2431 = vmatmul.mubr.msk.bf16.vlgmr.msra.gmra.mrb[4].mxu0 %vm542_vm2, %v512_v43 }
 0x28f   : > { %2454 = vmatprep.mubr.msk.bf16.mxu0 %vm2882_vm1, %v2881_v9  ;;  %2451 = vmatpush3.bf16.msra.mxu0 %v2660_v59  ;;  %v2276_v59 = vld [vmem:[%s3594_s3 + $0x6] ss:$0 sm:$0xff] }
 0x290   : > { %2452 = vmatprep.subr.bf16.mxu0 %v2881_v9 }
 0x293   : > { %2453 = vmatpush3.bf16.msra.mxu0 %v2662_v61 }
 0x294   : > { %2464 = vmatprep.subr.bf16.mxu0 %v2881_v9 }
 0x361   : > { %v580_v45 = vpop.f32.mrb[4].mxu0 }
 0x362   : > { %v581_v46 = vadd.f32 %v2246_v44, %v580_v45  ;;  %v2432_v47 = vpop.f32.mrb[5].mxu0 }
 0x363   : > { %v583_v48 = vpop.f32.mrb[6].mxu0  ;;  %v2262_v47 = vld [vmem:[#allocation6 + $0x9] ss:$0 sm:$0xff] }
 0x364   : > { %v586_v49 = vmul.f32 0.5, %v581_v46  ;;  %v2433_v50 = vpop.f32.mrb[7].mxu0 }
 0x365   : > { %v2271_v50 = vld [vmem:[%s3594_s3 + $0x1] ss:$0 sm:$0xff] }
 0x366   : > { %v3153_v51 = vadd.f32 %v586_v49, %v3098_v0 }
 0x368   : > { %v588_v52 = vsel %vm344_vm0, %v3153_v51, 0.0 }
 0x369   : > { %589 = vadd.xlane.f32.xlu1 %v588_v52 }
 0x3f6   : > { %v590_v53 = vpop.xlane.xlu1 %589 }
 0x3f7   : > { %v591_v54 = vmul.f32 0.03125, %v590_v53 }
 0x3f9   : > { %v592_v55 = vsub.f32 %v3153_v51, %v591_v54  ;;  %v2272_v54 = vld [vmem:[%s3594_s3 + $0x2] ss:$0 sm:$0xff] }
 0x3fb   : > { %v593_v56 = vmul.f32 %v592_v55, %v592_v55 }
 0x3fd   : > { %v594_v57 = vsel %vm344_vm0, %v593_v56, 0.0 }
 0x3fe   : > { %595 = vadd.xlane.f32.xlu1 %v594_v57 }
 0x48b   : > { %v596_v62 = vpop.xlane.xlu1 %595 }
 0x48c   : > { %v597_v63 = vmul.f32 0.03125, %v596_v62 }
 0x48e   : > { %v598_v0 = vadd.f32 1e-05, %v597_v63 }
 0x490   : > { %2679 = vrsqrt.f32 %v598_v0 }
 0x49a   : > { %v2680_v1 = vpop.eup %2679 }
 0x49b   : > { %v600_v3 = vmul.f32 %v2680_v1, %v592_v55 }
 0x49d   : > { %v606_v5 = vmul.f32 %v2252_v2, %v600_v3  ;;  %v2273_v2 = vld [vmem:[%s3594_s3 + $0x3] ss:$0 sm:$0xff] }
 0x49f   : > { %v612_v6 = vadd.f32 %v2253_v4, %v606_v5 }
 0x4a1   : > { %v617_v8 = vpack.c.bf16 %v612_v6, %v612_v6 }
 0x4a3   : > { %2439 = vmatmul.mubr.msk.bf16.vlgmr.msra.gmra.mrb[4].mxu1 %vm344_vm0, %v617_v8  ;;  %2455 = vmatmul.mubr.msk.bf16.vlgmr.msra.gmra.mrb[8].mxu0 %vm344_vm0, %v617_v8 }
 0x4a4   : > { %2443 = vmatpush3.bf16.msra.mxu1 %v2663_v7  ;;  %2446 = vmatprep.mubr.msk.bf16.mxu1 %vm2882_vm1, %v2881_v9  ;;  %v2277_v7 = vld [vmem:[%s3594_s3 + $0x7] ss:$0 sm:$0xff] }
 0x4a5   : > { %2444 = vmatprep.subr.bf16.mxu1 %v2881_v9  ;;  %2466 = vmatprep.mubr.msk.bf16.mxu0 %vm2882_vm1, %v2881_v9 }
 0x4a8   : > { %2445 = vmatpush3.bf16.msra.mxu1 %v2664_v10 }
 0x4a9   : > { %2458 = vmatprep.subr.bf16.mxu1 %v2881_v9 }
 0x4ab   : > { %2447 = vmatmul.mubr.msk.bf16.vlgmr.msra.gmra.mrb[8].mxu1 %vm344_vm0, %v617_v8 }
 0x4ac   : > { %2460 = vmatprep.mubr.msk.bf16.mxu1 %vm2882_vm1, %v2881_v9 }
 0x576   : > { %v672_v14 = vpop.f32.mrb[4].mxu1  ;;  %v3194_v15 = vpop.f32.mrb[8].mxu0 }
 0x577   : > { %v673_v16 = vadd.f32 %v2254_v13, %v672_v14  ;;  %v2440_v17 = vpop.f32.mrb[5].mxu1  ;;  %v2456_v18 = vpop.f32.mrb[9].mxu0  ;;  %v3241_v55 = vadd.f32 %v2262_v47, %v3194_v15  ;;  %v2278_v13 = vld [vmem:[%s3593_s2 + $0x20] sm:$0xff] }
 0x578   : > { %v675_v19 = vpop.f32.mrb[6].mxu1  ;;  %v797_v20 = vpop.f32.mrb[10].mxu0  ;;  %v903_v14 = vld [vmem:[%s3593_s2] sm:$0xff] }
 0x579   : > { %801 = vrot.lane.b32.xlu1 %v673_v16, %s2885_s22  ;;  %v2441_v21 = vpop.f32.mrb[7].mxu1  ;;  %v2457_v22 = vpop.f32.mrb[11].mxu0  ;;  %v863_v33 = vadd.f32 %v2270_v30, %v673_v16  ;;  %v899_v34 = vadd.f32 %v2274_v32, %v673_v16  ;;  %v1415_v62 = vpack.c.bf16 %v3241_v55, %v3241_v55  ;;  %v1339_v32 = vlaneseq }
 0x57a   : > { %v2286_v22 = vld [vmem:[%s3593_s2 + $0x60] sm:$0xff] }
 0x57b   : > { %v867_v35 = vpack.c.bf16 %v863_v33, %v863_v33  ;;  %v1424_v5 = vsel %vm1422_vm4, %v1415_v62, 0 }
 0x57e   : > { %v733_v24 = vpop.f32.mrb[8].mxu1 }
 0x57f   : > { %v734_v25 = vadd.f32 %v2258_v23, %v733_v24  ;;  %v2448_v26 = vpop.f32.mrb[9].mxu1 }
 0x580   : > { %v736_v27 = vpop.f32.mrb[10].mxu1 }
 0x581   : > { %814 = vrot.lane.b32.xlu1 %v734_v25, %s2886_s23  ;;  %811 = vrot.lane.b32.xlu0 %v734_v25, %s2885_s22  ;;  %v2449_v28 = vpop.f32.mrb[11].mxu1  ;;  %v871_v29 = vpack.c.bf16 %v734_v25, %v734_v25 }
 0x583   : > { %v1143_v31 = vsel %vm1138_vm3, %v871_v29, 0 }
 0x584   : > { %2459 = vmatpush3.bf16.xpose.msra.mxu1 %v1143_v31  ;;  %v2294_v31 = vld [vmem:[%s3593_s2 + $0xa0] sm:$0xff] }
 0x585   : > { %817 = vrot.lane.b32.xlu1 %v734_v25, %s3602_s15  ;;  %804 = vrot.lane.b32.xlu0 %v673_v16, %s2886_s23  ;;  %v2290_v25 = vld [vmem:[%s3593_s2 + $0x80] sm:$0xff] }
 0x586   : > { %2470 = vmatprep.subr.bf16.mxu1 %v2881_v9 }
 0x589   : > { %807 = vrot.lane.b32.xlu1 %v673_v16, %s3602_s15  ;;  %909 = vperm.xlu0 %2621, %v899_v34   ;;  %v2282_v16 = vld [vmem:[%s3593_s2 + $0x40] sm:$0xff]  ;;  %s2896_s15 = smov 24  }
 0x58b   : > { %2461 = vmatmul.mubr.msk.bf16.vlgmr.msra.gmra.mrb[12].mxu1 %vm1138_vm3, %v867_v35  ;;  %v1327_v35 = vld [vmem:[%s3083_s11] sm:$0x1] }
 0x58c   : > { %2472 = vmatprep.mubr.msk.bf16.mxu1 %vm2882_vm1, %v2881_v9  ;;  %vm1331_vm5 = vcmp.gt.f32.partialorder %v1327_v35, 0.0  ;;  %v2292_v35 = vld [vmem:[%s3593_s2 + $0x90] sm:$0xff] }
 0x58d   : > { %941 = vperm.xlu1 %2622, %v899_v34   ;;  %2624 = vset.pattern.permute.xlu0 %v2888_v36 }
 0x58e   : > { %999 = vperm.xlu0 %2624, %v899_v34  }
 0x591   : > { %2623 = vset.pattern.permute.xlu1 %v2889_v37 }
 0x592   : > { %970 = vperm.xlu1 %2623, %v899_v34   ;;  %2626 = vset.pattern.permute.xlu0 %v2890_v38 }
 0x593   : > { %1057 = vperm.xlu0 %2626, %v899_v34  }
 0x596   : > { %2625 = vset.pattern.permute.xlu1 %v2891_v39 }
 0x597   : > { %1028 = vperm.xlu1 %2625, %v899_v34   ;;  %2627 = vset.pattern.permute.xlu0 %v2892_v40 }
 0x598   : > { %1086 = vperm.xlu0 %2627, %v899_v34  }
 0x59b   : > { %2628 = vset.pattern.permute.xlu1 %v2893_v41 }
 0x59c   : > { %1115 = vperm.xlu1 %2628, %v899_v34   ;;  %2630 = vset.pattern.permute.xlu0 %v2884_v12 }
 0x5a0   : > { %2629 = vset.pattern.permute.xlu1 %v2883_v11 }
 0x5eb   : > { %v802_v43 = vpop.permute.xlu1 %801 }
 0x5ec   : > { %v3224_v44 = vadd.f32 %v2275_v42, %v802_v43  ;;  %v864_v58 = vadd.f32 %v2271_v50, %v802_v43 }
 0x5ee   : > { %914 = vperm.xlu1 %2629, %v3224_v44   ;;  %945 = vperm.xlu0 %2630, %v3224_v44   ;;  %v868_v0 = vpack.c.bf16 %v864_v58, %v864_v58 }
 0x5f2   : > { %2631 = vset.pattern.permute.xlu1 %v2889_v37  ;;  %2633 = vset.pattern.permute.xlu0 %v2891_v39 }
 0x5f3   : > { %974 = vperm.xlu1 %2631, %v3224_v44   ;;  %v815_v45 = vpop.permute.xlu1 %814  ;;  %1032 = vperm.xlu0 %2633, %v3224_v44   ;;  %v812_v46 = vpop.permute.xlu0 %811 }
 0x5f4   : > { %v873_v48 = vpack.c.bf16 %v815_v45, %v815_v45  ;;  %v872_v49 = vpack.c.bf16 %v812_v46, %v812_v46  ;;  %v1335_v46 = vsel %vm1331_vm5, 1, %v2883_v11 }
 0x5f6   : > { %v1235_v52 = vsel %vm1138_vm3, %v873_v48, 0  ;;  %v1189_v53 = vsel %vm1138_vm3, %v872_v49, 0 }
 0x5f7   : > { %2632 = vset.pattern.permute.xlu1 %v2888_v36  ;;  %2638 = vset.pattern.permute.xlu0 %v2890_v38  ;;  %v805_v56 = vpop.permute.xlu0 %804  ;;  %v818_v57 = vpop.permute.xlu1 %817 }
 0x5f8   : > { %2465 = vmatpush3.bf16.xpose.msra.mxu0 %v1189_v53  ;;  %2471 = vmatpush3.bf16.xpose.msra.mxu1 %v1235_v52  ;;  %v865_v60 = vadd.f32 %v2272_v54, %v805_v56  ;;  %v874_v61 = vpack.c.bf16 %v818_v57, %v818_v57  ;;  %v901_v63 = vadd.f32 %v2276_v59, %v805_v56 }
 0x5f9   : > { %1003 = vperm.xlu1 %2632, %v3224_v44   ;;  %1061 = vperm.xlu0 %2638, %v3224_v44  }
 0x5fa   : > { %2476 = vmatprep.subr.bf16.mxu0 %v2881_v9  ;;  %2482 = vmatprep.subr.bf16.mxu1 %v2881_v9  ;;  %v869_v1 = vpack.c.bf16 %v865_v60, %v865_v60  ;;  %v1281_v4 = vsel %vm1138_vm3, %v874_v61, 0 }
 0x5fb   : > { %v808_v3 = vpop.permute.xlu1 %807 }
 0x5fc   : > { %v866_v6 = vadd.f32 %v2273_v2, %v808_v3  ;;  %v902_v10 = vadd.f32 %v2277_v7, %v808_v3 }
 0x5fd   : > { %2634 = vset.pattern.permute.xlu1 %v2883_v11  ;;  %2641 = vset.pattern.permute.xlu0 %v2888_v36 }
 0x5fe   : > { %1007 = vperm.xlu0 %2641, %v901_v63   ;;  %919 = vperm.xlu1 %2634, %v901_v63   ;;  %v870_v8 = vpack.c.bf16 %v866_v6, %v866_v6 }
 0x5ff   : > { %2467 = vmatmul.mubr.msk.bf16.vlgmr.msra.gmra.mrb[12].mxu0 %vm1138_vm3, %v868_v0  ;;  %2473 = vmatmul.mubr.msk.bf16.vlgmr.msra.gmra.mrb[16].mxu1 %vm1138_vm3, %v869_v1 }
 0x600   : > { %2477 = vmatpush3.bf16.xpose.msra.mxu0 %v1281_v4  ;;  %2483 = vmatpush3.bf16.msra.mxu1 %v1424_v5 }
 0x601   : > { %2478 = vmatprep.mubr.msk.bf16.mxu0 %vm2882_vm1, %v2881_v9  ;;  %2484 = vmatprep.mubr.msk.bf16.mxu1 %vm2882_vm1, %v2881_v9 }
 0x602   : > { %2643 = vset.pattern.permute.xlu0 %v2893_v41  ;;  %2635 = vset.pattern.permute.xlu1 %v2884_v12 }
 0x603   : > { %1119 = vperm.xlu0 %2643, %v3224_v44   ;;  %949 = vperm.xlu1 %2635, %v901_v63  }
 0x604   : > { %2488 = vmatprep.subr.bf16.mxu0 %v2881_v9  ;;  %2494 = vmatprep.subr.bf16.mxu1 %v2881_v9 }
 0x607   : > { %2479 = vmatmul.mubr.msk.bf16.vlgmr.msra.gmra.mrb[16].mxu0 %vm1138_vm3, %v870_v8  ;;  %2645 = vset.pattern.permute.xlu0 %v2890_v38 }
 0x608   : > { %2636 = vset.pattern.permute.xlu1 %v2883_v11  ;;  %1065 = vperm.xlu0 %2645, %v901_v63   ;;  %v910_v15 = vpop.permute.xlu0 %909 }
 0x609   : > { %924 = vperm.xlu1 %2636, %v902_v10   ;;  %2490 = vmatprep.mubr.msk.bf16.mxu0 %vm2882_vm1, %v2881_v9  ;;  %v927_v19 = vmul.f32 %v910_v15, %v903_v14  ;;  %v2283_v15 = vld [vmem:[%s3593_s2 + $0x48] sm:$0xff] }
 0x60c   : > { %2648 = vset.pattern.permute.xlu0 %v2892_v40 }
 0x60d   : > { %2637 = vset.pattern.permute.xlu1 %v2884_v12  ;;  %1098 = vperm.xlu0 %2648, %v902_v10   ;;  %v942_v12 = vpop.permute.xlu1 %941  ;;  %v1000_v23 = vpop.permute.xlu0 %999 }
 0x60e   : > { %953 = vperm.xlu1 %2637, %v902_v10   ;;  %v956_v18 = vmul.f32 %v2278_v13, %v942_v12  ;;  %v1014_v27 = vmul.f32 %v2286_v22, %v1000_v23  ;;  %v904_v12 = vld [vmem:[%s3593_s2 + $0x8] sm:$0xff]  ;;  %v2284_v22 = vld [vmem:[%s3593_s2 + $0x50] sm:$0xff] }
 0x60f   : > { %v2279_v13 = vld [vmem:[%s3593_s2 + $0x28] sm:$0xff] }
 0x610   : > { %v960_v21 = vadd.f32 %v956_v18, %v927_v19  ;;  %v2287_v19 = vld [vmem:[%s3593_s2 + $0x68] sm:$0xff] }
 0x611   : > { %2650 = vset.pattern.permute.xlu0 %v2893_v41  ;;  %v971_v17 = vpop.permute.xlu1 %970 }
 0x612   : > { %2639 = vset.pattern.permute.xlu1 %v2889_v37  ;;  %v985_v20 = vmul.f32 %v2282_v16, %v971_v17  ;;  %v1058_v30 = vpop.permute.xlu0 %1057  ;;  %v2280_v16 = vld [vmem:[%s3593_s2 + $0x30] sm:$0xff] }
 0x613   : > { %978 = vperm.xlu1 %2639, %v901_v63   ;;  %v1072_v34 = vmul.f32 %v2294_v31, %v1058_v30 }
 0x614   : > { %v989_v24 = vadd.f32 %v985_v20, %v960_v21  ;;  %v905_v20 = vld [vmem:[%s3593_s2 + $0x10] sm:$0xff] }
 0x616   : > { %v1029_v26 = vpop.permute.xlu1 %1028  ;;  %v1018_v28 = vadd.f32 %v1014_v27, %v989_v24 }
 0x617   : > { %982 = vperm.xlu1 %2639, %v902_v10   ;;  %v1043_v29 = vmul.f32 %v2290_v25, %v1029_v26  ;;  %v1087_v37 = vpop.permute.xlu0 %1086 }
 0x619   : > { %v1047_v33 = vadd.f32 %v1043_v29, %v1018_v28 }
 0x61b   : > { %2640 = vset.pattern.permute.xlu1 %v2892_v40 }
 0x61c   : > { %1090 = vperm.xlu1 %2640, %v3224_v44  }
 0x620   : > { %2642 = vset.pattern.permute.xlu1 %v2888_v36  ;;  %v2298_v36 = vld [vmem:[%s3593_s2 + $0xc0] sm:$0xff] }
 0x621   : > { %1011 = vperm.xlu1 %2642, %v902_v10   ;;  %v1101_v42 = vmul.f32 %v2298_v36, %v1087_v37  ;;  %v2281_v37 = vld [vmem:[%s3593_s2 + $0x38] sm:$0xff] }
 0x625   : > { %2644 = vset.pattern.permute.xlu1 %v2891_v39  ;;  %v1076_v39 = vadd.f32 %v1072_v34, %v1047_v33  ;;  %v2288_v33 = vld [vmem:[%s3593_s2 + $0x70] sm:$0xff] }
 0x626   : > { %1036 = vperm.xlu1 %2644, %v901_v63  }
 0x627   : > { %v1105_v44 = vadd.f32 %v1101_v42, %v1076_v39  ;;  %v906_v42 = vld [vmem:[%s3593_s2 + $0x18] sm:$0xff] }
 0x62a   : > { %1040 = vperm.xlu1 %2644, %v902_v10  }
 0x62e   : > { %2646 = vset.pattern.permute.xlu1 %v2890_v38  ;;  %v1340_v38 = vshrl.u32 %v1339_v32, 7  ;;  %v2291_v32 = vld [vmem:[%s3593_s2 + $0x88] sm:$0xff] }
 0x62f   : > { %1069 = vperm.xlu1 %2646, %v902_v10  }
 0x630   : > { %v3316_v43 = vsub.s32 0, %v1340_v38 }
 0x632   : > { %v1342_v47 = vrot.slane %v1335_v46, %v3316_v43  ;;  %v1329_v46 = vld [vmem:[%s3083_s11 + $0x2] sm:$0x1] }
 0x633   : > { %2647 = vset.pattern.permute.xlu1 %v2892_v40  ;;  %v2302_v40 = vld [vmem:[%s3593_s2 + $0xe0] sm:$0xff]  ;;  %vm1333_vm7 = vcmp.gt.f32.partialorder %v1329_v46, 0.0 }
 0x634   : > { %1094 = vperm.xlu1 %2647, %v901_v63   ;;  %vm1355_vm6 = vcmp.eq.s32.totalorder %v1342_v47, 1  ;;  %v2295_v47 = vld [vmem:[%s3593_s2 + $0xa8] sm:$0xff] }
 0x638   : > { %2649 = vset.pattern.permute.xlu1 %v2893_v41  ;;  %v1116_v41 = vpop.permute.xlu1 %1115 }
 0x639   : > { %1123 = vperm.xlu1 %2649, %v901_v63   ;;  %v1130_v45 = vmul.f32 %v2302_v40, %v1116_v41 }
 0x63b   : > { %v1134_v48 = vadd.f32 %v1130_v45, %v1105_v44  ;;  %v2285_v44 = vld [vmem:[%s3593_s2 + $0x58] sm:$0xff] }
 0x63d   : > { %1127 = vperm.xlu1 %2649, %v902_v10  }
 0x65e   : > { %v1179_v49 = vpop.f32.mrb[12].mxu1 }
 0x65f   : > { %v1180_v50 = vadd.f32 %v1179_v49, %v1134_v48  ;;  %v2462_v52 = vpop.f32.mrb[13].mxu1  ;;  %v2299_v49 = vld [vmem:[%s3593_s2 + $0xc8] sm:$0xff] }
 0x660   : > { %v1182_v53 = vpop.f32.mrb[14].mxu1 }
 0x661   : > { %v1323_v54 = vmul.f32 0.35355338, %v1180_v50  ;;  %v2463_v56 = vpop.f32.mrb[15].mxu1  ;;  %v1328_v50 = vld [vmem:[%s3083_s11 + $0x1] sm:$0x1] }
 0x662   : > { %v2296_v56 = vld [vmem:[%s3593_s2 + $0xb0] sm:$0xff]  ;;  %vm1332_vm8 = vcmp.gt.f32.partialorder %v1328_v50, 0.0 }
 0x663   : > { %v3320_v57 = vsel %vm1355_vm6, %v1323_v54, -1e+09 }
 0x664   : > { %v1363_v58 = vsel %vm1138_vm3, %v3320_v57, -inf }
 0x665   : > { %1364 = vmax.xlane.f32.xlu0 %v1363_v58 }
 0x66d   : > { %v915_v59 = vpop.permute.xlu1 %914  ;;  %v946_v5 = vpop.permute.xlu0 %945 }
 0x66e   : > { %v928_v17 = vmul.f32 %v915_v59, %v904_v12  ;;  %v957_v18 = vmul.f32 %v2279_v13, %v946_v5 }
 0x670   : > { %v961_v26 = vadd.f32 %v957_v18, %v928_v17  ;;  %v1336_v17 = vsel %vm1332_vm8, 1, %v2883_v11 }
 0x672   : > { %v975_v60 = vpop.permute.xlu1 %974  ;;  %v1033_v7 = vpop.permute.xlu0 %1032 }
 0x673   : > { %v986_v23 = vmul.f32 %v2283_v15, %v975_v60  ;;  %v1044_v40 = vmul.f32 %v2291_v32, %v1033_v7  ;;  %v2289_v60 = vld [vmem:[%s3593_s2 + $0x78] sm:$0xff] }
 0x674   : > { %v2297_v15 = vld [vmem:[%s3593_s2 + $0xb8] sm:$0xff] }
 0x675   : > { %v990_v30 = vadd.f32 %v986_v23, %v961_v26 }
 0x678   : > { %v1004_v61 = vpop.permute.xlu1 %1003  ;;  %v1062_v10 = vpop.permute.xlu0 %1061 }
 0x679   : > { %v1015_v27 = vmul.f32 %v2287_v19, %v1004_v61  ;;  %v2300_v61 = vld [vmem:[%s3593_s2 + $0xd0] sm:$0xff] }
 0x67b   : > { %v1019_v36 = vadd.f32 %v1015_v27, %v990_v30 }
 0x67d   : > { %v920_v62 = vpop.permute.xlu1 %919  ;;  %v1008_v21 = vpop.permute.xlu0 %1007  ;;  %v1048_v52 = vadd.f32 %v1044_v40, %v1019_v36 }
 0x67e   : > { %v929_v28 = vmul.f32 %v920_v62, %v905_v20  ;;  %v1016_v41 = vmul.f32 %v2288_v33, %v1008_v21  ;;  %v1073_v62 = vmul.f32 %v2295_v47, %v1062_v10  ;;  %v1330_v21 = vld [vmem:[%s3083_s11 + $0x3] sm:$0x1]  ;;  %s2095_s11 = sshll.u32 %s3421_s14, 4  ;;  %s3514_s11 = int_to_ptr.vmem [resolvable:$true] %s2095_s11 }
 0x67f   : > { %vm1334_vm9 = vcmp.gt.f32.partialorder %v1330_v21, 0.0  ;;  %p2778_p13 = scmp.lt.s32.totalorder %s3514_s11, %s2776_s10 }
 0x680   : > { %v1077_v7 = vadd.f32 %v1073_v62, %v1048_v52 }
 0x682   : > { %v950_v63 = vpop.permute.xlu1 %949  ;;  %v1120_v34 = vpop.permute.xlu0 %1119 }
 0x683   : > { %v958_v24 = vmul.f32 %v2280_v16, %v950_v63  ;;  %v1337_v16 = vsel %vm1333_vm7, 1, %v2883_v11 }
 0x684   : > { %v1350_v27 = vrot.slane %v1337_v16, %v3316_v43 }
 0x685   : > { %v962_v31 = vadd.f32 %v958_v24, %v929_v28  ;;  %v1346_v28 = vrot.slane %v1336_v17, %v3316_v43 }
 0x686   : > { %vm1357_vm10 = vcmp.eq.s32.totalorder %v1350_v27, 1 }
 0x687   : > { %v1066_v58 = vpop.permute.xlu0 %1065  ;;  %vm1356_vm11 = vcmp.eq.s32.totalorder %v1346_v28, 1 }
 0x688   : > { %v925_v0 = vpop.permute.xlu1 %924 }
 0x689   : > { %v930_v54 = vmul.f32 %v925_v0, %v906_v42 }
 0x68d   : > { %v954_v1 = vpop.permute.xlu1 %953 }
 0x68e   : > { %v959_v48 = vmul.f32 %v2281_v37, %v954_v1 }
 0x690   : > { %v963_v0 = vadd.f32 %v959_v48, %v930_v54 }
 0x692   : > { %v979_v2 = vpop.permute.xlu1 %978 }
 0x693   : > { %v987_v29 = vmul.f32 %v2284_v22, %v979_v2  ;;  %v2293_v2 = vld [vmem:[%s3593_s2 + $0x98] sm:$0xff] }
 0x695   : > { %v991_v38 = vadd.f32 %v987_v29, %v962_v31  ;;  %v1099_v29 = vpop.permute.xlu0 %1098 }
 0x696   : > { %v983_v3 = vpop.permute.xlu1 %982 }
 0x697   : > { %v1020_v53 = vadd.f32 %v1016_v41, %v991_v38  ;;  %v988_v59 = vmul.f32 %v2285_v44, %v983_v3  ;;  %v2304_v3 = vld [vmem:[%s3593_s2 + $0xf0] sm:$0xff]  ;;  %v1338_v44 = vsel %vm1334_vm9, 1, %v2883_v11 }
 0x699   : > { %v992_v10 = vadd.f32 %v988_v59, %v963_v0  ;;  %v1354_v59 = vrot.slane %v1338_v44, %v3316_v43 }
 0x69b   : > { %v1091_v4 = vpop.permute.xlu1 %1090  ;;  %vm1358_vm12 = vcmp.eq.s32.totalorder %v1354_v59, 1 }
 0x69c   : > { %v1102_v63 = vmul.f32 %v2299_v49, %v1091_v4  ;;  %v2303_v4 = vld [vmem:[%s3593_s2 + $0xe8] sm:$0xff] }
 0x69d   : > { %v1131_v22 = vmul.f32 %v2303_v4, %v1120_v34  ;;  %v2305_v34 = vld [vmem:[%s3593_s2 + $0xf8] sm:$0xff] }
 0x69e   : > { %v1106_v18 = vadd.f32 %v1102_v63, %v1077_v7 }
 0x6a0   : > { %v1012_v6 = vpop.permute.xlu1 %1011  ;;  %v1135_v32 = vadd.f32 %v1131_v22, %v1106_v18 }
 0x6a1   : > { %v1017_v12 = vmul.f32 %v2289_v60, %v1012_v6 }
 0x6a3   : > { %v1021_v23 = vadd.f32 %v1017_v12, %v992_v10 }
 0x6a5   : > { %v1037_v8 = vpop.permute.xlu1 %1036 }
 0x6a6   : > { %v1045_v45 = vmul.f32 %v2292_v35, %v1037_v8  ;;  %v1074_v8 = vmul.f32 %v2296_v56, %v1066_v58 }
 0x6a8   : > { %v1049_v1 = vadd.f32 %v1045_v45, %v1020_v53 }
 0x6a9   : > { %v3330_v14 = vpop.permute.xlu1 %1040 }
 0x6aa   : > { %v1046_v19 = vmul.f32 %v2293_v2, %v3330_v14  ;;  %v1078_v20 = vadd.f32 %v1074_v8, %v1049_v1  ;;  %v2301_v14 = vld [vmem:[%s3593_s2 + $0xd8] sm:$0xff] }
 0x6ab   : > { %v1104_v45 = vmul.f32 %v2301_v14, %v1099_v29 }
 0x6ac   : > { %v1050_v30 = vadd.f32 %v1046_v19, %v1021_v23 }
 0x6ae   : > { %v1070_v25 = vpop.permute.xlu1 %1069 }
 0x6af   : > { %v1075_v24 = vmul.f32 %v2297_v15, %v1070_v25 }
 0x6b1   : > { %v1079_v36 = vadd.f32 %v1075_v24, %v1050_v30 }
 0x6b3   : > { %v1095_v39 = vpop.permute.xlu1 %1094  ;;  %v1108_v54 = vadd.f32 %v1104_v45, %v1079_v36 }
 0x6b4   : > { %v1103_v13 = vmul.f32 %v2300_v61, %v1095_v39 }
 0x6b6   : > { %v1107_v26 = vadd.f32 %v1103_v13, %v1078_v20 }
 0x6b8   : > { %v1124_v5 = vpop.permute.xlu1 %1123 }
 0x6b9   : > { %v1132_v6 = vmul.f32 %v2304_v3, %v1124_v5 }
 0x6bb   : > { %v1136_v33 = vadd.f32 %v1132_v6, %v1107_v26 }
 0x6bc   : > { %v1128_v31 = vpop.permute.xlu1 %1127 }
 0x6bd   : > { %v1133_v46 = vmul.f32 %v2305_v34, %v1128_v31 }
 0x6bf   : > { %v1137_v60 = vadd.f32 %v1133_v46, %v1108_v54 }
 0x6d2   : > { %v1225_v25 = vpop.f32.mrb[12].mxu0  ;;  %v1271_v35 = vpop.f32.mrb[16].mxu1 }
 0x6d3   : > { %v1226_v37 = vadd.f32 %v1225_v25, %v1135_v32  ;;  %v1272_v38 = vadd.f32 %v1271_v35, %v1136_v33  ;;  %v2468_v39 = vpop.f32.mrb[13].mxu0  ;;  %v2474_v40 = vpop.f32.mrb[17].mxu1 }
 0x6d4   : > { %v1228_v41 = vpop.f32.mrb[14].mxu0  ;;  %v1274_v42 = vpop.f32.mrb[18].mxu1 }
 0x6d5   : > { %v1324_v47 = vmul.f32 0.35355338, %v1226_v37  ;;  %v1325_v48 = vmul.f32 0.35355338, %v1272_v38  ;;  %v2469_v49 = vpop.f32.mrb[15].mxu0  ;;  %v2475_v50 = vpop.f32.mrb[19].mxu1 }
 0x6d7   : > { %v1361_v52 = vsel %vm1357_vm10, %v1325_v48, -1e+09  ;;  %v1360_v53 = vsel %vm1356_vm11, %v1324_v47, -1e+09 }
 0x6d8   : > { %v1369_v56 = vsel %vm1138_vm3, %v1361_v52, -inf  ;;  %v1366_v58 = vsel %vm1138_vm3, %v1360_v53, -inf }
 0x6d9   : > { %1370 = vmax.xlane.f32.xlu0 %v1369_v56  ;;  %1367 = vmax.xlane.f32.xlu1 %v1366_v58  ;;  %v2665_v56 = vld [vmem:[%s3596_s5 + $0x70] sm:$0xff]  }
 0x6da   : > { %v1317_v61 = vpop.f32.mrb[16].mxu0 }
 0x6db   : > { %v1318_v11 = vadd.f32 %v1317_v61, %v1137_v60  ;;  %v2480_v62 = vpop.f32.mrb[17].mxu0 }
 0x6dc   : > { %v1320_v63 = vpop.f32.mrb[18].mxu0 }
 0x6dd   : > { %v1326_v1 = vmul.f32 0.35355338, %v1318_v11  ;;  %v2481_v0 = vpop.f32.mrb[19].mxu0 }
 0x6de   : > { %v2666_v0 = vld [vmem:[%s3596_s5 + $0x78] sm:$0xff]  }
 0x6df   : > { %v1362_v2 = vsel %vm1358_vm12, %v1326_v1, -1e+09 }
 0x6e0   : > { %v1372_v3 = vsel %vm1138_vm3, %v1362_v2, -inf }
 0x6e1   : > { %1373 = vmax.xlane.f32.xlu0 %v1372_v3 }
 0x6f2   : > { %v1365_v5 = vpop.xlane.xlu0 %1364 }
 0x6f3   : > { %v1375_v7 = vsub.f32 %v3320_v57, %v1365_v5 }
 0x6f5   : > { %v1379_v8 = vmul.f32 1.442695, %v1375_v7 }
 0x6f7   : > { %2681 = vpow2.f32 %v1379_v8 }
 0x701   : > { %v2682_v12 = vpop.eup %2681 }
 0x702   : > { %v1387_v13 = vsel %vm1138_vm3, %v2682_v12, 0.0 }
 0x703   : > { %1388 = vadd.xlane.f32.xlu0 %v1387_v13 }
 0x766   : > { %v1371_v4 = vpop.xlane.xlu0 %1370  ;;  %v1368_v10 = vpop.xlane.xlu1 %1367 }
 0x767   : > { %v1377_v15 = vsub.f32 %v1361_v52, %v1371_v4  ;;  %v1376_v16 = vsub.f32 %v1360_v53, %v1368_v10 }
 0x769   : > { %v1383_v17 = vmul.f32 1.442695, %v1377_v15  ;;  %v1381_v18 = vmul.f32 1.442695, %v1376_v16 }
 0x76b   : > { %2683 = vpow2.f32 %v1383_v17 }
 0x76c   : > { %2685 = vpow2.f32 %v1381_v18  ;;  %v2317_v18 = vld [vmem:[#allocation6 + $0xa] ss:$0 sm:$0xff] }
 0x76e   : > { %v1374_v21 = vpop.xlane.xlu0 %1373 }
 0x76f   : > { %v1378_v23 = vsub.f32 %v1362_v2, %v1374_v21 }
 0x771   : > { %v1385_v26 = vmul.f32 1.442695, %v1378_v23 }
 0x775   : > { %v2684_v19 = vpop.eup %2683 }
 0x776   : > { %v2686_v20 = vpop.eup %2685  ;;  %v1393_v6 = vsel %vm1138_vm3, %v2684_v19, 0.0 }
 0x777   : > { %v1390_v57 = vsel %vm1138_vm3, %v2686_v20, 0.0  ;;  %1394 = vadd.xlane.f32.xlu0 %v1393_v6 }
 0x778   : > { %1391 = vadd.xlane.f32.xlu1 %v1390_v57 }
 0x789   : > { %824 = vrot.lane.b32.xlu1 %v3241_v55, %s2886_s23  ;;  %s3512_s23 = scalar_lea.hbm %s3598_s7, %s2357_s9 }
 0x78d   : > { %821 = vrot.lane.b32.xlu0 %v3241_v55, %s2885_s22  ;;  %s3614_s22 = smov 104  }
 0x790   : > { %v1389_v22 = vpop.xlane.xlu0 %1388 }
 0x791   : > { %2687 = vrcp.f32 %v1389_v22 }
 0x792   : > { %2689 = vpow2.f32 %v1385_v26 }
 0x79b   : > { %v2688_v24 = vpop.eup %2687 }
 0x79c   : > { %v1403_v27 = vmul.f32 %v2688_v24, %v2682_v12  ;;  %v2690_v29 = vpop.eup %2689 }
 0x79d   : > { %v1396_v30 = vsel %vm1138_vm3, %v2690_v29, 0.0 }
 0x79e   : > { %1407 = vst.msk [vmem:[%s3421_s14] sm:$0xff] %vm1138_vm3, %v1403_v27  ;;  %v1411_v28 = vpack.c.bf16 %v1403_v27, %v1403_v27 }
 0x7a0   : > { %2485 = vmatmul.mubr.msk.bf16.vlgmr.msra.gmra.mrb[20].mxu1 %vm1138_vm3, %v1411_v28 }
 0x7a1   : > { %2496 = vmatprep.mubr.msk.bf16.mxu1 %vm2882_vm1, %v2881_v9 }
 0x7ad   : > { %1397 = vadd.xlane.f32.xlu1 %v1396_v30  ;;  %v2669_v30 = vld [vmem:[%s3596_s5 + $0x88] sm:$0xff]  }
 0x7be   : > { %827 = vrot.lane.b32.xlu1 %v3241_v55, %s3614_s22 }
 0x804   : > { %v1395_v31 = vpop.xlane.xlu0 %1394 }
 0x805   : > { %v1392_v32 = vpop.xlane.xlu1 %1391  ;;  %2691 = vrcp.f32 %v1395_v31  ;;  %v2670_v31 = vld [vmem:[%s3596_s5 + $0x98] sm:$0xff]  }
 0x806   : > { %2693 = vrcp.f32 %v1392_v32 }
 0x808   : > { %v822_v33 = vpop.permute.xlu0 %821 }
 0x809   : > { %v825_v14 = vpop.permute.xlu1 %824  ;;  %v1416_v34 = vpack.c.bf16 %v822_v33, %v822_v33 }
 0x80a   : > { %v1417_v25 = vpack.c.bf16 %v825_v14, %v825_v14 }
 0x80b   : > { %v1470_v35 = vsel %vm1422_vm4, %v1416_v34, 0 }
 0x80c   : > { %v1516_v36 = vsel %vm1422_vm4, %v1417_v25, 0  ;;  %2489 = vmatpush3.bf16.msra.mxu0 %v1470_v35  ;;  %v2318_v25 = vld [vmem:[#allocation6 + $0xb] ss:$0 sm:$0xff] }
 0x80d   : > { %2495 = vmatpush3.bf16.msra.mxu1 %v1516_v36  ;;  %2500 = vmatprep.subr.bf16.mxu0 %v2881_v9  ;;  %v2319_v36 = vld [vmem:[#allocation6 + $0xc] ss:$0 sm:$0xff] }
 0x80e   : > { %2506 = vmatprep.subr.bf16.mxu1 %v2881_v9 }
 0x80f   : > { %v2692_v55 = vpop.eup %2691 }
 0x810   : > { %v2694_v37 = vpop.eup %2693  ;;  %v1405_v38 = vmul.f32 %v2692_v55, %v2684_v19 }
 0x811   : > { %v1404_v39 = vmul.f32 %v2694_v37, %v2686_v20 }
 0x812   : > { %1409 = vst.msk [vmem:[%s3421_s14 + $0x10] sm:$0xff] %vm1138_vm3, %v1405_v38  ;;  %v1413_v40 = vpack.c.bf16 %v1405_v38, %v1405_v38 }
 0x813   : > { %1408 = vst.msk [vmem:[%s3421_s14 + $0x8] sm:$0xff] %vm1138_vm3, %v1404_v39  ;;  %v1412_v41 = vpack.c.bf16 %v1404_v39, %v1404_v39  ;;  %v2671_v39 = vld [vmem:[%s3596_s5 + $0xa0] sm:$0xff]  }
 0x814   : > { %2497 = vmatmul.mubr.msk.bf16.vlgmr.msra.gmra.mrb[24].mxu1 %vm1138_vm3, %v1413_v40  ;;  %v2672_v40 = vld [vmem:[%s3596_s5 + $0xa8] sm:$0xff]  }
 0x815   : > { %2491 = vmatmul.mubr.msk.bf16.vlgmr.msra.gmra.mrb[20].mxu0 %vm1138_vm3, %v1412_v41  ;;  %2510 = vmatprep.mubr.msk.bf16.mxu1 %vm2882_vm1, %v2881_v9  ;;  %v2324_v41 = vld [vmem:[#allocation6 + $0xe] ss:$0 sm:$0xff] }
 0x816   : > { %2502 = vmatprep.mubr.msk.bf16.mxu0 %vm2882_vm1, %v2881_v9  ;;  %2507 = vmatpush3.bf16.msra.mxu1 %v2665_v56 }
 0x817   : > { %2508 = vmatprep.subr.bf16.mxu1 %v2881_v9 }
 0x81a   : > { %2509 = vmatpush3.bf16.msra.mxu1 %v2666_v0 }
 0x81b   : > { %2522 = vmatprep.subr.bf16.mxu1 %v2881_v9 }
 0x83a   : > { %v1398_v42 = vpop.xlane.xlu1 %1397 }
 0x83b   : > { %2695 = vrcp.f32 %v1398_v42 }
 0x83e   : > { %v828_v44 = vpop.permute.xlu1 %827 }
 0x83f   : > { %v1418_v45 = vpack.c.bf16 %v828_v44, %v828_v44 }
 0x841   : > { %v1562_v46 = vsel %vm1422_vm4, %v1418_v45, 0 }
 0x842   : > { %2501 = vmatpush3.bf16.msra.mxu0 %v1562_v46 }
 0x843   : > { %2514 = vmatprep.subr.bf16.mxu0 %v2881_v9 }
 0x845   : > { %v2696_v47 = vpop.eup %2695 }
 0x846   : > { %v1406_v48 = vmul.f32 %v2696_v47, %v2690_v29  ;;  %v2668_v29 = vld [vmem:[%s3596_s5 + $0x90] sm:$0xff]  }
 0x848   : > { %1410 = vst.msk [vmem:[%s3421_s14 + $0x18] sm:$0xff] %vm1138_vm3, %v1406_v48  ;;  %v1414_v49 = vpack.c.bf16 %v1406_v48, %v1406_v48  ;;  %s2777_s14 = scalar_lea.vmem %s2776_s10, 1024 }
 0x84a   : > { %2503 = vmatmul.mubr.msk.bf16.vlgmr.msra.gmra.mrb[24].mxu0 %vm1138_vm3, %v1414_v49 }
 0x84b   : > { %2518 = vmatprep.mubr.msk.bf16.mxu0 %vm2882_vm1, %v2881_v9 }
 0x873   : > { %v1460_v50 = vpop.f32.mrb[20].mxu1 }
 0x874   : > { %v2486_v52 = vpop.f32.mrb[21].mxu1 }
 0x875   : > { %v1463_v53 = vpop.f32.mrb[22].mxu1 }
 0x876   : > { %v2487_v54 = vpop.f32.mrb[23].mxu1 }
 0x8e7   : > { %v1552_v58 = vpop.f32.mrb[24].mxu1 }
 0x8e8   : > { %v1506_v59 = vpop.f32.mrb[20].mxu0  ;;  %1609 = vrot.lane.b32.xlu0 %v1552_v58, %s2894_s30  ;;  %v2498_v60 = vpop.f32.mrb[25].mxu1  ;;  %v2320_v58 = vld [vmem:[#allocation6 + $0xd] ss:$0 sm:$0xff]  ;;  %s2771_s30 = scalar_lea.vmem %s3514_s11, 512 }
 0x8e9   : > { %1605 = vrot.lane.b32.xlu1 %v1506_v59, %s2895_s17  ;;  %v2492_v61 = vpop.f32.mrb[21].mxu0  ;;  %v1555_v11 = vpop.f32.mrb[26].mxu1  ;;  %p2772_p6 = scmp.ne.s32.totalorder %s3514_s11, %s2771_s30  ;;  %p2779_p3 = scmp.lt.s32.totalorder %s2777_s14, %s2771_s30 }
 0x8ea   : > { %v1509_v62 = vpop.f32.mrb[22].mxu0  ;;  %v2499_v63 = vpop.f32.mrb[27].mxu1  ;;  %v1918_v61 = vld [vmem:[#allocation6 + $0x13] sm:$0x1]  ;;  %v2329_v11 = vld [vmem:[#allocation6 + $0x19] ss:$0 sm:$0xff] }
 0x8eb   : > { %v2493_v1 = vpop.f32.mrb[23].mxu0  ;;  %v2330_v62 = vld [vmem:[#allocation6 + $0x1a] ss:$0 sm:$0xff]  ;;  %v1919_v63 = vadd.f32 1e-05, %v1918_v61  ;;  %p2773_p8 = pnand %p2772_p6, %p3031_p12  ;;  %p2780_p7 = por %p2779_p3, %p2778_p13 }
 0x8ec   : > { %v2331_v1 = vld [vmem:[#allocation6 + $0x1b] ss:$0 sm:$0xff] }
 0x8ed   : > { %p2774_p10 = pneg %p2773_p8 }
 0x8ef   : > { %p2781_p9 = pnand %p2780_p7, %p2774_p10 }
 0x91d   : > { %v1598_v2 = vpop.f32.mrb[24].mxu0 }
 0x91e   : > { %1613 = vrot.lane.b32.xlu1 %v1598_v2, %s2896_s15  ;;  %v2504_v3 = vpop.f32.mrb[25].mxu0 }
 0x91f   : > { %v1601_v5 = vpop.f32.mrb[26].mxu0 }
 0x920   : > { %v2505_v7 = vpop.f32.mrb[27].mxu0 }
 0x95a   : > { %v1610_v12 = vpop.permute.xlu0 %1609 }
 0x95b   : > { %v1606_v8 = vpop.permute.xlu1 %1605 }
 0x95c   : > { %v1616_v13 = vsel %vm1138_vm3, %v1460_v50, %v1606_v8 }
 0x95d   : > { %v1618_v4 = vsel %vm1617_vm13, %v1616_v13, %v1610_v12  ;;  %v2332_v12 = vld [vmem:[#allocation6 + $0x1c] ss:$0 sm:$0xff] }
 0x990   : > { %v1614_v10 = vpop.permute.xlu1 %1613 }
 0x991   : > { %v1620_v15 = vsel %vm1619_vm14, %v1618_v4, %v1614_v10 }
 0x992   : > { %v1625_v16 = vpack.c.bf16 %v1620_v15, %v1620_v15  ;;  %v2333_v15 = vld [vmem:[#allocation6 + $0x1d] ss:$0 sm:$0xff] }
 0x994   : > { %2511 = vmatmul.mubr.msk.bf16.vlgmr.msra.gmra.mrb[28].mxu1 %vm344_vm0, %v1625_v16 }
 0x995   : > { %2526 = vmatprep.mubr.msk.bf16.mxu1 %vm2882_vm1, %v2881_v9  ;;  %2523 = vmatpush3.bf16.msra.mxu1 %v2668_v29 }
 0x996   : > { %2524 = vmatprep.subr.bf16.mxu1 %v2881_v9 }
 0x999   : > { %2525 = vmatpush3.bf16.msra.mxu1 %v2670_v31 }
 0xa67   : > { %v1675_v17 = vpop.f32.mrb[28].mxu1 }
 0xa68   : > { %v1681_v19 = vadd.f32 %v1675_v17, %v3153_v51  ;;  %v2512_v20 = vpop.f32.mrb[29].mxu1  ;;  %v2667_v51 = vld [vmem:[%s3596_s5 + $0x80] sm:$0xff]  }
 0xa69   : > { %v1678_v6 = vpop.f32.mrb[30].mxu1  ;;  %2515 = vmatpush3.bf16.msra.mxu0 %v2667_v51  ;;  %v2336_v51 = vld [vmem:[#allocation6 + $0xf] ss:$0 sm:$0xff] }
 0xa6a   : > { %v3466_v57 = vadd.f32 %v2317_v18, %v1681_v19  ;;  %v2513_v21 = vpop.f32.mrb[31].mxu1  ;;  %2516 = vmatprep.subr.bf16.mxu0 %v2881_v9  ;;  %v2334_v19 = vld [vmem:[#allocation6 + $0x1e] ss:$0 sm:$0xff] }
 0xa6c   : > { %v1688_v22 = vsel %vm344_vm0, %v3466_v57, 0.0 }
 0xa6d   : > { %1689 = vadd.xlane.f32.xlu0 %v1688_v22  ;;  %2517 = vmatpush3.bf16.msra.mxu0 %v2669_v30  ;;  %v2335_v22 = vld [vmem:[#allocation6 + $0x1f] ss:$0 sm:$0xff]  ;;  %v2337_v30 = vld [vmem:[#allocation6 + $0x12] ss:$0 sm:$0xff] }
 0xa6e   : > { %2530 = vmatprep.subr.bf16.mxu0 %v2881_v9 }
 0xafa   : > { %v1690_v23 = vpop.xlane.xlu0 %1689 }
 0xafb   : > { %v1691_v24 = vmul.f32 0.03125, %v1690_v23 }
 0xafd   : > { %v1692_v26 = vsub.f32 %v3466_v57, %v1691_v24 }
 0xaff   : > { %v1693_v27 = vmul.f32 %v1692_v26, %v1692_v26 }
 0xb01   : > { %v1694_v28 = vsel %vm344_vm0, %v1693_v27, 0.0 }
 0xb02   : > { %1695 = vadd.xlane.f32.xlu1 %v1694_v28 }
 0xb8f   : > { %v1696_v32 = vpop.xlane.xlu1 %1695 }
 0xb90   : > { %v1697_v33 = vmul.f32 0.03125, %v1696_v32 }
 0xb92   : > { %v1698_v14 = vadd.f32 1e-05, %v1697_v33 }
 0xb94   : > { %2697 = vrsqrt.f32 %v1698_v14  ;;  %v2338_v14 = vld [vmem:[#allocation6 + $0x10] ss:$0 sm:$0xff] }
 0xb9e   : > { %v2698_v34 = vpop.eup %2697 }
 0xb9f   : > { %v1700_v35 = vmul.f32 %v2698_v34, %v1692_v26 }
 0xba1   : > { %v1706_v55 = vmul.f32 %v2318_v25, %v1700_v35  ;;  %v2339_v25 = vld [vmem:[#allocation6 + $0x11] ss:$0 sm:$0xff] }
 0xba3   : > { %v1712_v37 = vadd.f32 %v2319_v36, %v1706_v55 }
 0xba5   : > { %v1717_v38 = vpack.c.bf16 %v1712_v37, %v1712_v37 }
 0xba7   : > { %2519 = vmatmul.mubr.msk.bf16.vlgmr.msra.gmra.mrb[28].mxu0 %vm344_vm0, %v1717_v38  ;;  %2527 = vmatmul.mubr.msk.bf16.vlgmr.msra.gmra.mrb[32].mxu1 %vm344_vm0, %v1717_v38 }
 0xba8   : > { %2534 = vmatprep.mubr.msk.bf16.mxu0 %vm2882_vm1, %v2881_v9  ;;  %2531 = vmatpush3.bf16.msra.mxu0 %v2671_v39 }
 0xba9   : > { %2532 = vmatprep.subr.bf16.mxu0 %v2881_v9 }
 0xbac   : > { %2533 = vmatpush3.bf16.msra.mxu0 %v2672_v40 }
 0xc7a   : > { %v1772_v42 = vpop.f32.mrb[28].mxu0  ;;  %v1833_v44 = vpop.f32.mrb[32].mxu1 }
 0xc7b   : > { %v1834_v45 = vadd.f32 %v2324_v41, %v1833_v44  ;;  %v2520_v46 = vpop.f32.mrb[29].mxu0  ;;  %v2528_v47 = vpop.f32.mrb[33].mxu1  ;;  %v1773_v59 = vadd.f32 %v2320_v58, %v1772_v42  ;;  %v2344_v44 = vld [vmem:[#allocation6 + $0x14] ss:$0 sm:$0xff] }
 0xc7c   : > { %v1775_v48 = vpop.f32.mrb[30].mxu0  ;;  %v1836_v49 = vpop.f32.mrb[34].mxu1 }
 0xc7d   : > { %v2328_v50 = vmul.f32 -1.442695, %v1834_v45  ;;  %v2521_v52 = vpop.f32.mrb[31].mxu0  ;;  %v2529_v53 = vpop.f32.mrb[35].mxu1 }
 0xc7f   : > { %2699 = vpow2.f32 %v2328_v50 }
 0xc89   : > { %v2700_v54 = vpop.eup %2699 }
 0xc8a   : > { %v1842_v56 = vadd.f32 1.0, %v2700_v54 }
 0xc8c   : > { %2701 = vrcp.f32 %v1842_v56 }
 0xc8d   : > { %2703 = vrsqrt.f32 %v1919_v63 }
 0xc96   : > { %v2702_v60 = vpop.eup %2701 }
 0xc97   : > { %v1845_v9 = vmul.f32 %v2702_v60, %v1773_v59  ;;  %v2704_v28 = vpop.eup %2703 }
 0xc98   : > { %v1924_v32 = vrot.slane %v2704_v28, %v3316_v43 }
 0xc99   : > { %1849 = vst.msk [vmem:[#allocation2 + $0x3] sm:$0xff] %vm344_vm0, %v1845_v9  ;;  %v2345_v9 = vld [vmem:[#allocation6 + $0x15] ss:$0 sm:$0xff] }
 0xca0   : > { %v1850_v0 = vld [vmem:[#allocation2] sm:$0xff] }
 0xca1   : > { %v1858_v2 = vld [vmem:[#allocation2 + $0x1] sm:$0xff]  ;;  %v1856_v5 = vmul.f32 %v2329_v11, %v1850_v0  ;;  %v2346_v11 = vld [vmem:[#allocation6 + $0x16] ss:$0 sm:$0xff] }
 0xca2   : > { %v1866_v3 = vld [vmem:[#allocation2 + $0x2] sm:$0xff]  ;;  %v1864_v7 = vmul.f32 %v2330_v62, %v1858_v2 }
 0xca3   : > { %v1874_v8 = vld [vmem:[#allocation2 + $0x3] sm:$0xff]  ;;  %v1872_v4 = vmul.f32 %v2331_v1, %v1866_v3 }
 0xca4   : > { %v1865_v13 = vadd.f32 %v1864_v7, %v1856_v5  ;;  %v1882_v10 = vld [vmem:[#allocation2 + $0x4] sm:$0xff]  ;;  %v1880_v17 = vmul.f32 %v2332_v12, %v1874_v8 }
 0xca5   : > { %v1890_v18 = vld [vmem:[#allocation2 + $0x5] sm:$0xff]  ;;  %v1888_v6 = vmul.f32 %v2333_v15, %v1882_v10 }
 0xca6   : > { %v1873_v16 = vadd.f32 %v1872_v4, %v1865_v13  ;;  %v1898_v21 = vld [vmem:[#allocation2 + $0x6] sm:$0xff]  ;;  %v1896_v24 = vmul.f32 %v2334_v19, %v1890_v18 }
 0xca7   : > { %v1904_v27 = vmul.f32 %v2335_v22, %v1898_v21 }
 0xca8   : > { %v1881_v20 = vadd.f32 %v1880_v17, %v1873_v16 }
 0xcaa   : > { %v1889_v23 = vadd.f32 %v1888_v6, %v1881_v20 }
 0xcac   : > { %v1897_v26 = vadd.f32 %v1896_v24, %v1889_v23 }
 0xcae   : > { %v1905_v29 = vadd.f32 %v1904_v27, %v1897_v26 }
 0xcb0   : > { %v1911_v31 = vadd.f32 %v2336_v51, %v1905_v29 }
 0xcb2   : > { %v1917_v33 = vsub.f32 %v1911_v31, %v2337_v30 }
 0xcb4   : > { %v1925_v34 = vmul.f32 %v1924_v32, %v1917_v33 }
 0xcb6   : > { %v1931_v35 = vmul.f32 %v2338_v14, %v1925_v34 }
 0xcb8   : > { %v1937_v36 = vadd.f32 %v2339_v25, %v1931_v35 }
 0xcba   : > { %v2340_v55 = vmul.f32 -1.442695, %v1937_v36 }
 0xcbc   : > { %2705 = vpow2.f32 %v2340_v55 }
 0xcc6   : > { %v2706_v37 = vpop.eup %2705 }
 0xcc7   : > { %v1941_v38 = vadd.f32 1.0, %v2706_v37 }
 0xcc9   : > { %2707 = vrcp.f32 %v1941_v38 }
 0xcd3   : > { %v2708_v39 = vpop.eup %2707 }
 0xcd4   : > { %v1944_v40 = vmul.f32 %v2708_v39, %v1937_v36 }
 0xcd6   : > { %v1949_v41 = vpack.c.bf16 %v1944_v40, %v1944_v40 }
 0xcd8   : > { %2535 = vmatmul.mubr.msk.bf16.vlgmr.msra.gmra.mrb[32].mxu0 %vm344_vm0, %v1949_v41 }
 0xdab   : > { %v1999_v42 = vpop.f32.mrb[32].mxu0 }
 0xdac   : > { %v2005_v43 = vadd.f32 %v1999_v42, %v3466_v57  ;;  %v2536_v45 = vpop.f32.mrb[33].mxu0 }
 0xdad   : > { %v2002_v46 = vpop.f32.mrb[34].mxu0 }
 0xdae   : > { %v2537_v47 = vpop.f32.mrb[35].mxu0  ;;  %v2011_v48 = vadd.f32 %v2344_v44, %v2005_v43 }
 0xdb0   : > { %v2012_v49 = vsel %vm344_vm0, %v2011_v48, 0.0 }
 0xdb1   : > { %2013 = vadd.xlane.f32.xlu0 %v2012_v49 }
 0xe3e   : > { %v2014_v50 = vpop.xlane.xlu0 %2013 }
 0xe3f   : > { %v2015_v52 = vmul.f32 0.03125, %v2014_v50 }
 0xe41   : > { %v2016_v53 = vsub.f32 %v2011_v48, %v2015_v52 }
 0xe43   : > { %v2017_v54 = vmul.f32 %v2016_v53, %v2016_v53 }
 0xe45   : > { %v2018_v56 = vsel %vm344_vm0, %v2017_v54, 0.0 }
 0xe46   : > { %2019 = vadd.xlane.f32.xlu0 %v2018_v56 }
 0xed3   : > { %v2020_v58 = vpop.xlane.xlu0 %2019 }
 0xed4   : > { %v2021_v59 = vmul.f32 0.03125, %v2020_v58 }
 0xed6   : > { %v2022_v60 = vadd.f32 1e-05, %v2021_v59 }
 0xed8   : > { %2709 = vrsqrt.f32 %v2022_v60 }
 0xee2   : > { %v2710_v57 = vpop.eup %2709 }
 0xee3   : > { %v2024_v61 = vmul.f32 %v2710_v57, %v2016_v53 }
 0xee5   : > { %v2030_v62 = vmul.f32 %v2345_v9, %v2024_v61 }
 0xee7   : > { %v2036_v63 = vadd.f32 %v2346_v11, %v2030_v62 }
 0xee9   : > { %v2037_v1 = vsel %vm344_vm0, %v2036_v63, 0.0 }
 0xeea   : > { %2038 = vadd.xlane.f32.xlu0 %v2037_v1 }
 0xf77   : > { %v2039_v0 = vpop.xlane.xlu0 %2038 }
 0xf78   : > { %v2040_v2 = vmul.f32 0.03125, %v2039_v0 }
 0xf7a   : > { %v2041_v3 = vsub.f32 %v2036_v63, %v2040_v2 }
 0xf7c   : > { %v2042_v5 = vmul.f32 %v2041_v3, %v2041_v3 }
 0xf7e   : > { %v2043_v7 = vsel %vm344_vm0, %v2042_v5, 0.0 }
 0xf7f   : > { %2044 = vadd.xlane.f32.xlu1 %v2043_v7 }
 0xf80   : > { %2784 = shalt.err (!%p2781_p9)
}
 0xf81   : > { %s2785_s15 = scalar_lea.hbm %s3512_s23, 512  ;;  %s2789_s16 = scalar_lea.hbm %s3598_s7, 1024 }
 0xf82   : > { %p2786_p2 = scmp.ne.s32.totalorder %s3512_s23, %s2785_s15  ;;  %p2790_p11 = scmp.lt.u32.totalorder %s3512_s23, %s3598_s7 }
 0xf83   : > { %p2791_p1 = scmp.lt.u32.totalorder %s2789_s16, %s2785_s15  ;;  %p2793_p6 = scmp.lt.u32.totalorder %s2785_s15, %s3512_s23 }
 0xf84   : > { %p2787_p0 = pnand %p2786_p2, %p3031_p12 }
 0xf85   : > { %p2792_p4 = por %p2791_p1, %p2790_p11 }
 0xf86   : > { %p2788_p5 = pneg %p2787_p0 }
 0xf87   : > { %p2794_p8 = por %p2793_p6, %p2792_p4 }
 0xf89   : > { %p2795_p10 = pnand %p2794_p8, %p2788_p5 }
 0xf8b   : > { %2798 = shalt.err (!%p2795_p10)
}
 0xf8c   : > { %s2898_s30 = smov 128   ;;  %s2232_s10 = sshll.u32 %s3079_s12, 3  ;;  %v2347_v10 = vld [vmem:[#allocation6 + $0x17] ss:$0 sm:$0xff]  ;;  %v2348_v16 = vld [vmem:[#allocation6 + $0x18] ss:$0 sm:$0xff] }
 0xf8d   : > { %2545 = dma.vmem_to_hbm [thread:$0]  (%p3031_p12), %s3514_s11, 512, %s3512_s23, %s2069_s29, %s2898_s30, %s2898_s30, %s2895_s17  }
 0xf8e   : > { %s2351_s14 = sshll.u32 %s2961_s28, 7  ;;  %s328_s15 = scalar_lea.vmem [#allocation8], %s2232_s10 }
 0xf8f   : > { %s2082_s20 = sshll.u32 %s328_s15, 4  ;;  %s3546_s17 = scalar_lea.hbm %s3597_s6, %s2351_s14  ;;  %s3548_s20 = int_to_ptr.vmem [resolvable:$true] %s2082_s20 }
 0xf90   : > { %s2064_s11 = scalar_lea.sflag [#allocation5], %s3079_s12  ;;  %s2799_s23 = scalar_lea.vmem %s3548_s20, 128 }
 0xf91   : > { %p2800_p13 = scmp.ne.s32.totalorder %s3548_s20, %s2799_s23  ;;  %s2899_s28 = smov [#allocation8]  }
 0xf92   : > { %s2803_s29 = sshll.u32 %s2899_s28, 4  ;;  %s2804_s29 = int_to_ptr.vmem [resolvable:$false] %s2803_s29 }
 0xf93   : > { %p2801_p3 = pnand %p2800_p13, %p3031_p12  ;;  %s2805_s22 = scalar_lea.vmem %s2804_s29, 256 }
 0xf94   : > { %p2806_p9 = scmp.lt.s32.totalorder %s3548_s20, %s2804_s29  ;;  %p2807_p2 = scmp.lt.s32.totalorder %s2805_s22, %s2799_s23 }
 0xf95   : > { %p2802_p7 = pneg %p2801_p3 }
 0xf96   : > { %p2808_p0 = por %p2807_p2, %p2806_p9 }
 0xf98   : > { %p2809_p5 = pnand %p2808_p0, %p2802_p7 }
0x100c   : > { %v2045_v8 = vpop.xlane.xlu1 %2044 }
0x100d   : > { %v2046_v12 = vmul.f32 0.03125, %v2045_v8 }
0x100f   : > { %v2047_v13 = vadd.f32 1e-05, %v2046_v12 }
0x1011   : > { %2711 = vrsqrt.f32 %v2047_v13 }
0x101b   : > { %v2712_v4 = vpop.eup %2711 }
0x101c   : > { %v2049_v15 = vmul.f32 %v2712_v4, %v2041_v3 }
0x101e   : > { %v2055_v17 = vmul.f32 %v2347_v10, %v2049_v15 }
0x1020   : > { %v2061_v18 = vadd.f32 %v2348_v16, %v2055_v17 }
0x1022   : > { %2062 = vst.msk [vmem:[%s328_s15] sm:$0xff] %vm344_vm0, %v2061_v18 }
0x1023   : > { %2812 = shalt.err (!%p2809_p5)
}
0x1024   : > { %s2813_s12 = scalar_lea.hbm %s3546_s17, 128  ;;  %s2817_s10 = scalar_lea.hbm %s3597_s6, 256 }
0x1025   : > { %p2814_p11 = scmp.ne.s32.totalorder %s3546_s17, %s2813_s12  ;;  %p2818_p6 = scmp.lt.u32.totalorder %s3546_s17, %s3597_s6 }
0x1026   : > { %p2819_p8 = scmp.lt.u32.totalorder %s2817_s10, %s2813_s12  ;;  %p2821_p13 = scmp.lt.u32.totalorder %s2813_s12, %s3546_s17 }
0x1027   : > { %p2815_p1 = pnand %p2814_p11, %p3031_p12 }
0x1028   : > { %p2820_p10 = por %p2819_p8, %p2818_p6 }
0x1029   : > { %p2816_p4 = pneg %p2815_p1 }
0x102a   : > { %p2822_p3 = por %p2821_p13, %p2820_p10 }
0x102c   : > { %p2823_p7 = pnand %p2822_p3, %p2816_p4 }
0x102e   : > { %2826 = shalt.err (!%p2823_p7)
}
0x102f   : > { %2544 = dma.vmem_to_hbm [thread:$0]  (%p3031_p12), %s3548_s20, 128, %s3546_s17, %s2064_s11  }
0x1030 PF: > { %s2110_s9 = sand.u32 1, %s2861_s24   ;;  %p3615_p9 = scmp.ne.s32.totalorder %s3604_s8, 0 }
0x1031   : > { %p3616_p2 = scmp.ge.s32.totalorder %s2873_s27, 2  ;;  %s2111_s16 = scalar_lea.sflag [#allocation5], %s2110_s9 }
0x1033   : > { %p2557_p0 = pnand %p3616_p2, %p3615_p9 }
0x1035   : > { %2852 = dma.done.wait (!%p2557_p0), %s2111_s16, 128  }
0x1036   : > { %2854 = vsyncadd (!%p2557_p0), %s2111_s16, 4294967168  ;;  %s2120_s23 = scalar_lea.sflag [#allocation10], %s2110_s9 }
0x1037   : > { %2856 = dma.done.wait (!%p2557_p0), %s2120_s23, 512  }
0x1038   : > { %2858 = vsyncadd (!%p2557_p0), %s2120_s23, 4294966784  ;;  %p25_p12 = scmp.ge.s32.totalorder %s2996_s13, 4   ;;  %s3617_s24 = smov %s2865_s25 }
0x1039   : > { %s3618_s25 = smov %s2869_s26  ;;  %s3619_s26 = smov %s3027_s18 }
0x103a   : > { %s3620_s27 = smov %s2996_s13  ;;  %27 = sbr.rel (!%p25_p12) target bundleno = 8 (0x8), region = 121 }
0x1041   :  { %2125 = vsyncpa [#allocation4], 1 }
0x1042   :  { %2127 = vsyncpa [#allocation4 + $0x1], 1 }
0x1043   :  { %2128 = vsyncpa [#allocation7], 1 }
0x1044   :  { %2129 = vsyncpa [#allocation5], 1 }
0x1045   :  { %2131 = vsyncpa [#allocation5 + $0x1], 1 }
0x1046   :  { %2132 = vsyncpa [#allocation10], 1 }
0x1047   :  { %2134 = vsyncpa [#allocation10 + $0x1], 1 }

</bundles_post_ra>
